<compile_context>
chip_gen: v5e
topology: v5e:2x2
jax: 0.10.0
libtpu: 0.0.40
codegen_flags: <defaults>
</compile_context>

<pallas_src>
import functools

import jax
import jax.numpy as jnp
from jax.experimental import pallas as pl
from jax.experimental.pallas import tpu as pltpu


# ---------------------------------------------------------------------------
# Kernel
# ---------------------------------------------------------------------------
def _realnvp_kernel(x_ref,
                    # fused t1|s1 params
                    f1w1, f1b1, f1w2, f1b2, f1w3, f1b3,
                    # fused t2|s2 params
                    f2w1, f2b1, f2w2, f2b2, f2w3, f2b3,
                    # outputs
                    z_ref, logdet_ref,
                    *, half_dim, act_dtype):
    x = x_ref[...]
    # Static lane slices inside one vreg lane-group (dim <= 128): cheap VPU work,
    # no extra HBM passes.
    lower = x[:, :half_dim]
    upper = x[:, half_dim:]

    def fused_net(h, w1, b1, w2, b2, w3, b3):
        # One 3-layer net of width 2*hidden computing [t | s] in the lanes.
        h = jnp.tanh((jnp.dot(h, w1[...], preferred_element_type=jnp.float32)
                      + b1[...]).astype(act_dtype))
        h = jnp.tanh((jnp.dot(h, w2[...], preferred_element_type=jnp.float32)
                      + b2[...]).astype(act_dtype))
        return jnp.dot(h, w3[...], preferred_element_type=jnp.float32) + b3[...]

    # --- fused t1/s1 network on `lower` (t in lanes [:half], s in [half:]) ---
    ts1 = fused_net(lower, f1w1, f1b1, f1w2, f1b2, f1w3, f1b3)
    t1 = ts1[:, :half_dim]
    s1 = ts1[:, half_dim:]
    upper_new = t1 + upper.astype(jnp.float32) * jnp.exp(s1)

    # --- fused t2/s2 network on the transformed upper half ---
    ts2 = fused_net(upper_new.astype(act_dtype), f2w1, f2b1, f2w2, f2b2, f2w3, f2b3)
    t2 = ts2[:, :half_dim]
    s2 = ts2[:, half_dim:]
    lower_new = t2 + lower.astype(jnp.float32) * jnp.exp(s2)

    # Single dense (tb, dim) store for z (concat fused into the kernel).
    z_ref[...] = jnp.concatenate([lower_new, upper_new], axis=1).astype(z_ref.dtype)

    # log_det emitted lane-major: reduce to (tb,) (lane-major) and store as a
    # (1, 1, tb) row block instead of a width-1 column.
    ld = jnp.sum(s1, axis=1) + jnp.sum(s2, axis=1)          # (tb,)
    logdet_ref[...] = ld.reshape(1, 1, ld.shape[0])


# ---------------------------------------------------------------------------
# Parameter construction / fusion
# ---------------------------------------------------------------------------
def init_fcnn_params(key, in_dim, out_dim, hidden_dim):
    """Deterministic PyTorch-Linear-style init; weights stored as (in, out)."""
    ks = jax.random.split(key, 6)

    def lin(kw, kb, fan_in, fan_out):
        bound = 1.0 / jnp.sqrt(jnp.float32(fan_in))
        w = jax.random.uniform(kw, (fan_in, fan_out), jnp.float32, -bound, bound)
        b = jax.random.uniform(kb, (1, fan_out), jnp.float32, -bound, bound)
        return w, b

    w1, b1 = lin(ks[0], ks[1], in_dim, hidden_dim)
    w2, b2 = lin(ks[2], ks[3], hidden_dim, hidden_dim)
    w3, b3 = lin(ks[4], ks[5], hidden_dim, out_dim)
    return (w1, b1, w2, b2, w3, b3)


def _block_diag(a, b):
    """[[a, 0], [0, b]] — packs two independent layers into one matmul."""
    za = jnp.zeros((a.shape[0], b.shape[1]), a.dtype)
    zb = jnp.zeros((b.shape[0], a.shape[1]), b.dtype)
    top = jnp.concatenate([a, za], axis=1)
    bot = jnp.concatenate([zb, b], axis=1)
    return jnp.concatenate([top, bot], axis=0)


def _fuse_fcnn_pair(t_params, s_params):
    """Pack a (t, s) pair of 3-layer FCNNs into one wider 3-layer FCNN.

    Layer 1: outputs concatenated along lanes -> (in, 2H)
    Layers 2/3: block-diagonal -> (2H, 2H) and (2H, 2*out)
    The fused output has t in lanes [:out] and s in lanes [out:].
    """
    tw1, tb1, tw2, tb2, tw3, tb3 = t_params
    sw1, sb1, sw2, sb2, sw3, sb3 = s_params
    w1 = jnp.concatenate([tw1, sw1], axis=1)
    b1 = jnp.concatenate([tb1, sb1], axis=1)
    w2 = _block_diag(tw2, sw2)
    b2 = jnp.concatenate([tb2, sb2], axis=1)
    w3 = _block_diag(tw3, sw3)
    b3 = jnp.concatenate([tb3, sb3], axis=1)
    return (w1, b1, w2, b2, w3, b3)


# ---------------------------------------------------------------------------
# Tile selection (>= 2 tiles for large batches, multiple-of-8 rows)
# ---------------------------------------------------------------------------
def _choose_batch_tile(B, batch_tile):
    # Small / moderate batches: one tile (block == full array dims is always legal).
    if B <= 8 or (B <= batch_tile and B < 256):
        return B
    # Otherwise target ~batch_tile rows per tile but keep >= 2 tiles so both
    # v7x TensorCores get work; round to a multiple of 8 sublanes.
    n_tiles = max(2, pl.cdiv(B, batch_tile))
    tb = pl.cdiv(B, n_tiles)
    tb = min(B, ((tb + 7) // 8) * 8)
    return tb


# ---------------------------------------------------------------------------
# Wrapper
# ---------------------------------------------------------------------------
def realnvp_forward(x, params, *, batch_tile=4096, compute_dtype=jnp.float32):
    """params = dict with keys 't1','s1','t2','s2', each a 6-tuple of arrays.

    compute_dtype: jnp.float32 (default, exact) or jnp.bfloat16 (v6e/v7x:
    halves activation/weight traffic and doubles tanh throughput; f32 MXU
    accumulation is kept).  Keep f32 on v5e (no bf16 VPU/EUP path).
    """
    B, dim = x.shape
    half = dim // 2

    f1 = _fuse_fcnn_pair(params["t1"], params["s1"])
    f2 = _fuse_fcnn_pair(params["t2"], params["s2"])
    flat_params = [p.astype(compute_dtype) for p in (list(f1) + list(f2))]
    x_in = x.astype(compute_dtype)

    tb = _choose_batch_tile(B, batch_tile)
    num_tiles = pl.cdiv(B, tb)
    grid = (num_tiles,)

    x_spec = pl.BlockSpec((tb, dim), lambda b: (b, 0))
    # Weights/biases: full-array blocks, constant index_map -> VMEM-resident
    # across all batch tiles.
    param_specs = [pl.BlockSpec(p.shape, lambda b: (0, 0)) for p in flat_params]

    two_h = flat_params[0].shape[1]          # fused width = 2 * hidden
    flops = 4 * B * (half * two_h + two_h * two_h + two_h * 2 * half)
    transcendentals = B * (4 * two_h + 2 * half)
    bytes_accessed = (x_in.dtype.itemsize * B * dim            # x in
                      + 4 * B * dim                            # z out
                      + 4 * num_tiles * tb                     # logdet out
                      + sum(int(p.size) * p.dtype.itemsize for p in flat_params))

    z, logdet_tiles = pl.pallas_call(
        functools.partial(_realnvp_kernel, half_dim=half, act_dtype=compute_dtype),
        out_shape=(
            jax.ShapeDtypeStruct((B, dim), jnp.float32),
            jax.ShapeDtypeStruct((num_tiles, 1, tb), jnp.float32),
        ),
        grid=grid,
        in_specs=[x_spec] + param_specs,
        out_specs=(
            pl.BlockSpec((tb, dim), lambda b: (b, 0)),
            pl.BlockSpec((1, 1, tb), lambda b: (b, 0, 0)),
        ),
        compiler_params=pltpu.CompilerParams(
            dimension_semantics=("parallel",)),
        cost_estimate=pl.CostEstimate(
            flops=flops,
            transcendentals=transcendentals,
            bytes_accessed=bytes_accessed),
    )(x_in, *flat_params)

    # Lane-major logdet slab -> (B,) is a metadata-only reshape + slice.
    # (Rows past B in the last partial tile are padding and are sliced off.)
    log_det = logdet_tiles.reshape(-1)[:B]
    return z, log_det


# ---------------------------------------------------------------------------
# Pure-JAX reference (mirrors the PyTorch forward) for verification
# ---------------------------------------------------------------------------
def realnvp_reference(x, params):
    half = x.shape[1] // 2

    def fcnn(h, p):
        w1, b1, w2, b2, w3, b3 = p
        h = jnp.tanh(h @ w1 + b1)
        h = jnp.tanh(h @ w2 + b2)
        return h @ w3 + b3

    lower, upper = x[:, :half], x[:, half:]
    t1 = fcnn(lower, params["t1"])
    s1 = fcnn(lower, params["s1"])
    upper = t1 + upper * jnp.exp(s1)
    t2 = fcnn(upper, params["t2"])
    s2 = fcnn(upper, params["s2"])
    lower = t2 + lower * jnp.exp(s2)
    z = jnp.concatenate([lower, upper], axis=1)
    log_det = jnp.sum(s1, axis=1) + jnp.sum(s2, axis=1)
    return z, log_det


if __name__ == "__main__":
    B, dim, hidden = 256, 16, 32     # dim must be even; cond_dim=None
    half = dim // 2

    key = jax.random.PRNGKey(0)
    kx, k1, k2, k3, k4 = jax.random.split(key, 5)
    x = jax.random.normal(kx, (B, dim), jnp.float32)

    params = {
        "t1": init_fcnn_params(k1, half, half, hidden),
        "s1": init_fcnn_params(k2, half, half, hidden),
        "t2": init_fcnn_params(k3, half, half, hidden),
        "s2": init_fcnn_params(k4, half, half, hidden),
    }

    z_ref, log_det_ref = realnvp_reference(x, params)

    # Main path: 2 tiles of 128 rows (exercises the parallel grid).
    z, log_det = realnvp_forward(x, params)
    jax.block_until_ready((z, log_det))
    assert jnp.allclose(z, z_ref, atol=1e-5, rtol=1e-5)
    assert jnp.allclose(log_det, log_det_ref, atol=1e-5, rtol=1e-5)

    # Remainder-tile path: 3 tiles of 88 rows, last tile partial (80 valid rows).
    z2, ld2 = realnvp_forward(x, params, batch_tile=96)
    jax.block_until_ready((z2, ld2))
    assert jnp.allclose(z2, z_ref, atol=1e-5, rtol=1e-5)
    assert jnp.allclose(ld2, log_det_ref, atol=1e-5, rtol=1e-5)

    # bf16 weights/activations with f32 accumulation (v6e/v7x option) — smoke test.
    z3, ld3 = realnvp_forward(x, params, compute_dtype=jnp.bfloat16)
    jax.block_until_ready((z3, ld3))
    assert bool(jnp.all(jnp.isfinite(z3))) and bool(jnp.all(jnp.isfinite(ld3)))

    print("KERNEL_OK")
</pallas_src>

<mosaic_0001>
module attributes {stable_mosaic.version = 11 : i64} {
  func.func @_realnvp_kernel(%arg0: i32, %arg1: memref<128x16xf32, #tpu.memory_space<vmem>>, %arg2: memref<8x64xf32, #tpu.memory_space<vmem>>, %arg3: memref<1x64xf32, #tpu.memory_space<vmem>>, %arg4: memref<64x64xf32, #tpu.memory_space<vmem>>, %arg5: memref<1x64xf32, #tpu.memory_space<vmem>>, %arg6: memref<64x16xf32, #tpu.memory_space<vmem>>, %arg7: memref<1x16xf32, #tpu.memory_space<vmem>>, %arg8: memref<8x64xf32, #tpu.memory_space<vmem>>, %arg9: memref<1x64xf32, #tpu.memory_space<vmem>>, %arg10: memref<64x64xf32, #tpu.memory_space<vmem>>, %arg11: memref<1x64xf32, #tpu.memory_space<vmem>>, %arg12: memref<64x16xf32, #tpu.memory_space<vmem>>, %arg13: memref<1x16xf32, #tpu.memory_space<vmem>>, %arg14: memref<128x16xf32, #tpu.memory_space<vmem>>, %arg15: memref<1x1x128xf32, #tpu.memory_space<vmem>>) attributes {dimension_semantics = [#tpu.dimension_semantics<parallel>], iteration_bounds = array<i64: 2>, scalar_prefetch = 0 : i64, scratch_operands = 0 : i64, tpu.core_type = #tpu.core_type<tc>, window_params = [{transform_indices = @transform_0, window_bounds = array<i64: 128, 16>}, {pipeline_mode = #tpu.pipeline_mode<synchronous>, transform_indices = @transform_1, window_bounds = array<i64: 8, 64>}, {pipeline_mode = #tpu.pipeline_mode<synchronous>, transform_indices = @transform_2, window_bounds = array<i64: 1, 64>}, {pipeline_mode = #tpu.pipeline_mode<synchronous>, transform_indices = @transform_3, window_bounds = array<i64: 64, 64>}, {pipeline_mode = #tpu.pipeline_mode<synchronous>, transform_indices = @transform_4, window_bounds = array<i64: 1, 64>}, {pipeline_mode = #tpu.pipeline_mode<synchronous>, transform_indices = @transform_5, window_bounds = array<i64: 64, 16>}, {pipeline_mode = #tpu.pipeline_mode<synchronous>, transform_indices = @transform_6, window_bounds = array<i64: 1, 16>}, {pipeline_mode = #tpu.pipeline_mode<synchronous>, transform_indices = @transform_7, window_bounds = array<i64: 8, 64>}, {pipeline_mode = #tpu.pipeline_mode<synchronous>, transform_indices = @transform_8, window_bounds = array<i64: 1, 64>}, {pipeline_mode = #tpu.pipeline_mode<synchronous>, transform_indices = @transform_9, window_bounds = array<i64: 64, 64>}, {pipeline_mode = #tpu.pipeline_mode<synchronous>, transform_indices = @transform_10, window_bounds = array<i64: 1, 64>}, {pipeline_mode = #tpu.pipeline_mode<synchronous>, transform_indices = @transform_11, window_bounds = array<i64: 64, 16>}, {pipeline_mode = #tpu.pipeline_mode<synchronous>, transform_indices = @transform_12, window_bounds = array<i64: 1, 16>}, {transform_indices = @transform_13, window_bounds = array<i64: 128, 16>}, {transform_indices = @transform_14, window_bounds = array<i64: 1, 1, 128>}]} {
    %c0 = arith.constant 0 : index
    %c0_0 = arith.constant 0 : index
    %0 = vector.load %arg1[%c0, %c0_0] : memref<128x16xf32, #tpu.memory_space<vmem>>, vector<128x16xf32>
    %1 = vector.extract_strided_slice %0 {offsets = [0, 0], sizes = [128, 8], strides = [1, 1]} : vector<128x16xf32> to vector<128x8xf32>
    %2 = vector.extract_strided_slice %0 {offsets = [0, 8], sizes = [128, 8], strides = [1, 1]} : vector<128x16xf32> to vector<128x8xf32>
    %c0_1 = arith.constant 0 : index
    %c0_2 = arith.constant 0 : index
    %3 = vector.load %arg2[%c0_1, %c0_2] : memref<8x64xf32, #tpu.memory_space<vmem>>, vector<8x64xf32>
    %cst = arith.constant dense<0.000000e+00> : vector<128x64xf32>
    %4 = tpu.matmul %1, %3, %cst {dimension_numbers = #tpu.dot_dimension_numbers<[1], [0], [0], [1], [0, 0, 1, 1], [], []>} : vector<128x8xf32>, vector<8x64xf32>, vector<128x64xf32> -> vector<128x64xf32>
    %c0_3 = arith.constant 0 : index
    %c0_4 = arith.constant 0 : index
    %5 = vector.load %arg3[%c0_3, %c0_4] : memref<1x64xf32, #tpu.memory_space<vmem>>, vector<1x64xf32>
    %6 = vector.broadcast %5 : vector<1x64xf32> to vector<128x64xf32>
    %7 = arith.addf %4, %6 : vector<128x64xf32>
    %8 = math.tanh %7 : vector<128x64xf32>
    %c0_5 = arith.constant 0 : index
    %c0_6 = arith.constant 0 : index
    %9 = vector.load %arg4[%c0_5, %c0_6] : memref<64x64xf32, #tpu.memory_space<vmem>>, vector<64x64xf32>
    %cst_7 = arith.constant dense<0.000000e+00> : vector<128x64xf32>
    %10 = tpu.matmul %8, %9, %cst_7 {dimension_numbers = #tpu.dot_dimension_numbers<[1], [0], [0], [1], [0, 0, 1, 1], [], []>} : vector<128x64xf32>, vector<64x64xf32>, vector<128x64xf32> -> vector<128x64xf32>
    %c0_8 = arith.constant 0 : index
    %c0_9 = arith.constant 0 : index
    %11 = vector.load %arg5[%c0_8, %c0_9] : memref<1x64xf32, #tpu.memory_space<vmem>>, vector<1x64xf32>
    %12 = vector.broadcast %11 : vector<1x64xf32> to vector<128x64xf32>
    %13 = arith.addf %10, %12 : vector<128x64xf32>
    %14 = math.tanh %13 : vector<128x64xf32>
    %c0_10 = arith.constant 0 : index
    %c0_11 = arith.constant 0 : index
    %15 = vector.load %arg6[%c0_10, %c0_11] : memref<64x16xf32, #tpu.memory_space<vmem>>, vector<64x16xf32>
    %cst_12 = arith.constant dense<0.000000e+00> : vector<128x16xf32>
    %16 = tpu.matmul %14, %15, %cst_12 {dimension_numbers = #tpu.dot_dimension_numbers<[1], [0], [0], [1], [0, 0, 1, 1], [], []>} : vector<128x64xf32>, vector<64x16xf32>, vector<128x16xf32> -> vector<128x16xf32>
    %c0_13 = arith.constant 0 : index
    %c0_14 = arith.constant 0 : index
    %17 = vector.load %arg7[%c0_13, %c0_14] : memref<1x16xf32, #tpu.memory_space<vmem>>, vector<1x16xf32>
    %18 = vector.broadcast %17 : vector<1x16xf32> to vector<128x16xf32>
    %19 = arith.addf %16, %18 : vector<128x16xf32>
    %20 = vector.extract_strided_slice %19 {offsets = [0, 0], sizes = [128, 8], strides = [1, 1]} : vector<128x16xf32> to vector<128x8xf32>
    %21 = vector.extract_strided_slice %19 {offsets = [0, 8], sizes = [128, 8], strides = [1, 1]} : vector<128x16xf32> to vector<128x8xf32>
    %22 = math.exp %21 : vector<128x8xf32>
    %23 = arith.mulf %2, %22 : vector<128x8xf32>
    %24 = arith.addf %20, %23 : vector<128x8xf32>
    %c0_15 = arith.constant 0 : index
    %c0_16 = arith.constant 0 : index
    %25 = vector.load %arg8[%c0_15, %c0_16] : memref<8x64xf32, #tpu.memory_space<vmem>>, vector<8x64xf32>
    %cst_17 = arith.constant dense<0.000000e+00> : vector<128x64xf32>
    %26 = tpu.matmul %24, %25, %cst_17 {dimension_numbers = #tpu.dot_dimension_numbers<[1], [0], [0], [1], [0, 0, 1, 1], [], []>} : vector<128x8xf32>, vector<8x64xf32>, vector<128x64xf32> -> vector<128x64xf32>
    %c0_18 = arith.constant 0 : index
    %c0_19 = arith.constant 0 : index
    %27 = vector.load %arg9[%c0_18, %c0_19] : memref<1x64xf32, #tpu.memory_space<vmem>>, vector<1x64xf32>
    %28 = vector.broadcast %27 : vector<1x64xf32> to vector<128x64xf32>
    %29 = arith.addf %26, %28 : vector<128x64xf32>
    %30 = math.tanh %29 : vector<128x64xf32>
    %c0_20 = arith.constant 0 : index
    %c0_21 = arith.constant 0 : index
    %31 = vector.load %arg10[%c0_20, %c0_21] : memref<64x64xf32, #tpu.memory_space<vmem>>, vector<64x64xf32>
    %cst_22 = arith.constant dense<0.000000e+00> : vector<128x64xf32>
    %32 = tpu.matmul %30, %31, %cst_22 {dimension_numbers = #tpu.dot_dimension_numbers<[1], [0], [0], [1], [0, 0, 1, 1], [], []>} : vector<128x64xf32>, vector<64x64xf32>, vector<128x64xf32> -> vector<128x64xf32>
    %c0_23 = arith.constant 0 : index
    %c0_24 = arith.constant 0 : index
    %33 = vector.load %arg11[%c0_23, %c0_24] : memref<1x64xf32, #tpu.memory_space<vmem>>, vector<1x64xf32>
    %34 = vector.broadcast %33 : vector<1x64xf32> to vector<128x64xf32>
    %35 = arith.addf %32, %34 : vector<128x64xf32>
    %36 = math.tanh %35 : vector<128x64xf32>
    %c0_25 = arith.constant 0 : index
    %c0_26 = arith.constant 0 : index
    %37 = vector.load %arg12[%c0_25, %c0_26] : memref<64x16xf32, #tpu.memory_space<vmem>>, vector<64x16xf32>
    %cst_27 = arith.constant dense<0.000000e+00> : vector<128x16xf32>
    %38 = tpu.matmul %36, %37, %cst_27 {dimension_numbers = #tpu.dot_dimension_numbers<[1], [0], [0], [1], [0, 0, 1, 1], [], []>} : vector<128x64xf32>, vector<64x16xf32>, vector<128x16xf32> -> vector<128x16xf32>
    %c0_28 = arith.constant 0 : index
    %c0_29 = arith.constant 0 : index
    %39 = vector.load %arg13[%c0_28, %c0_29] : memref<1x16xf32, #tpu.memory_space<vmem>>, vector<1x16xf32>
    %40 = vector.broadcast %39 : vector<1x16xf32> to vector<128x16xf32>
    %41 = arith.addf %38, %40 : vector<128x16xf32>
    %42 = vector.extract_strided_slice %41 {offsets = [0, 0], sizes = [128, 8], strides = [1, 1]} : vector<128x16xf32> to vector<128x8xf32>
    %43 = vector.extract_strided_slice %41 {offsets = [0, 8], sizes = [128, 8], strides = [1, 1]} : vector<128x16xf32> to vector<128x8xf32>
    %44 = math.exp %43 : vector<128x8xf32>
    %45 = arith.mulf %1, %44 : vector<128x8xf32>
    %46 = arith.addf %42, %45 : vector<128x8xf32>
    %47 = tpu.concatenate %46, %24 in 1 : vector<128x8xf32>, vector<128x8xf32> -> vector<128x16xf32>
    %c0_30 = arith.constant 0 : index
    %c0_31 = arith.constant 0 : index
    %48 = vector.load %arg14[%c0_30, %c0_31] : memref<128x16xf32, #tpu.memory_space<vmem>>, vector<128x16xf32>
    tpu.vector_store %arg14[%c0_30, %c0_31], %47 {strides = array<i32>} : memref<128x16xf32, #tpu.memory_space<vmem>>, vector<128x16xf32>,
    %cst_32 = arith.constant dense<0.000000e+00> : vector<128xf32>
    %49 = vector.multi_reduction <add>, %21, %cst_32 [1] : vector<128x8xf32> to vector<128xf32>
    %cst_33 = arith.constant dense<0.000000e+00> : vector<128xf32>
    %50 = vector.multi_reduction <add>, %43, %cst_33 [1] : vector<128x8xf32> to vector<128xf32>
    %51 = arith.addf %49, %50 : vector<128xf32>
    %52 = vector.shape_cast %51 : vector<128xf32> to vector<1x1x128xf32>
    %c0_34 = arith.constant 0 : index
    %c0_35 = arith.constant 0 : index
    %c0_36 = arith.constant 0 : index
    %53 = vector.load %arg15[%c0_34, %c0_35, %c0_36] : memref<1x1x128xf32, #tpu.memory_space<vmem>>, vector<1x1x128xf32>
    tpu.vector_store %arg15[%c0_34, %c0_35, %c0_36], %52 {strides = array<i32>} : memref<1x1x128xf32, #tpu.memory_space<vmem>>, vector<1x1x128xf32>,
    return
  }
  func.func @transform_0(%arg0: i32) -> (i32, i32) {
    %c0_i32 = arith.constant 0 : i32
    %c0_i32_0 = arith.constant 0 : i32
    return %arg0, %c0_i32 : i32, i32
  }
  func.func @transform_1(%arg0: i32) -> (i32, i32) {
    %c0_i32 = arith.constant 0 : i32
    %c0_i32_0 = arith.constant 0 : i32
    %c0_i32_1 = arith.constant 0 : i32
    return %c0_i32, %c0_i32_0 : i32, i32
  }
  func.func @transform_2(%arg0: i32) -> (i32, i32) {
    %c0_i32 = arith.constant 0 : i32
    %c0_i32_0 = arith.constant 0 : i32
    %c0_i32_1 = arith.constant 0 : i32
    return %c0_i32, %c0_i32_0 : i32, i32
  }
  func.func @transform_3(%arg0: i32) -> (i32, i32) {
    %c0_i32 = arith.constant 0 : i32
    %c0_i32_0 = arith.constant 0 : i32
    %c0_i32_1 = arith.constant 0 : i32
    return %c0_i32, %c0_i32_0 : i32, i32
  }
  func.func @transform_4(%arg0: i32) -> (i32, i32) {
    %c0_i32 = arith.constant 0 : i32
    %c0_i32_0 = arith.constant 0 : i32
    %c0_i32_1 = arith.constant 0 : i32
    return %c0_i32, %c0_i32_0 : i32, i32
  }
  func.func @transform_5(%arg0: i32) -> (i32, i32) {
    %c0_i32 = arith.constant 0 : i32
    %c0_i32_0 = arith.constant 0 : i32
    %c0_i32_1 = arith.constant 0 : i32
    return %c0_i32, %c0_i32_0 : i32, i32
  }
  func.func @transform_6(%arg0: i32) -> (i32, i32) {
    %c0_i32 = arith.constant 0 : i32
    %c0_i32_0 = arith.constant 0 : i32
    %c0_i32_1 = arith.constant 0 : i32
    return %c0_i32, %c0_i32_0 : i32, i32
  }
  func.func @transform_7(%arg0: i32) -> (i32, i32) {
    %c0_i32 = arith.constant 0 : i32
    %c0_i32_0 = arith.constant 0 : i32
    %c0_i32_1 = arith.constant 0 : i32
    return %c0_i32, %c0_i32_0 : i32, i32
  }
  func.func @transform_8(%arg0: i32) -> (i32, i32) {
    %c0_i32 = arith.constant 0 : i32
    %c0_i32_0 = arith.constant 0 : i32
    %c0_i32_1 = arith.constant 0 : i32
    return %c0_i32, %c0_i32_0 : i32, i32
  }
  func.func @transform_9(%arg0: i32) -> (i32, i32) {
    %c0_i32 = arith.constant 0 : i32
    %c0_i32_0 = arith.constant 0 : i32
    %c0_i32_1 = arith.constant 0 : i32
    return %c0_i32, %c0_i32_0 : i32, i32
  }
  func.func @transform_10(%arg0: i32) -> (i32, i32) {
    %c0_i32 = arith.constant 0 : i32
    %c0_i32_0 = arith.constant 0 : i32
    %c0_i32_1 = arith.constant 0 : i32
    return %c0_i32, %c0_i32_0 : i32, i32
  }
  func.func @transform_11(%arg0: i32) -> (i32, i32) {
    %c0_i32 = arith.constant 0 : i32
    %c0_i32_0 = arith.constant 0 : i32
    %c0_i32_1 = arith.constant 0 : i32
    return %c0_i32, %c0_i32_0 : i32, i32
  }
  func.func @transform_12(%arg0: i32) -> (i32, i32) {
    %c0_i32 = arith.constant 0 : i32
    %c0_i32_0 = arith.constant 0 : i32
    %c0_i32_1 = arith.constant 0 : i32
    return %c0_i32, %c0_i32_0 : i32, i32
  }
  func.func @transform_13(%arg0: i32) -> (i32, i32) {
    %c0_i32 = arith.constant 0 : i32
    %c0_i32_0 = arith.constant 0 : i32
    return %arg0, %c0_i32 : i32, i32
  }
  func.func @transform_14(%arg0: i32) -> (i32, i32, i32) {
    %c0_i32 = arith.constant 0 : i32
    %c0_i32_0 = arith.constant 0 : i32
    %c0_i32_1 = arith.constant 0 : i32
    return %arg0, %c0_i32, %c0_i32_0 : i32, i32, i32
  }
}

</mosaic_0001>

<bundles_post_ra>
// kernel: tpu_custom_call.1
= control target key start
LH: loop header
LB: loop body
LE: loop exit
PB: predicated region body
PF: predicated region fallthrough
CT: control target
= control target key end

     0   :  { %s3594_s0 = inlined_call_operand.vmem [shape: f32[256,16], index: 0, kind: input, shape index: {}]   ;;  %s3595_s1 = inlined_call_operand.vmem [shape: f32[8,64], index: 1, kind: input, shape index: {}]   ;;  %s3596_s2 = inlined_call_operand.vmem [shape: f32[1,64], index: 2, kind: input, shape index: {}]   ;;  %s3597_s3 = inlined_call_operand.vmem [shape: f32[64,64], index: 3, kind: input, shape index: {}]   ;;  %s3598_s4 = inlined_call_operand.vmem [shape: f32[1,64], index: 4, kind: input, shape index: {}]   ;;  %s3599_s5 = inlined_call_operand.vmem [shape: f32[64,16], index: 5, kind: input, shape index: {}]   ;;  %s3600_s6 = inlined_call_operand.vmem [shape: f32[1,16], index: 6, kind: input, shape index: {}]   ;;  %s3601_s7 = inlined_call_operand.vmem [shape: f32[8,64], index: 7, kind: input, shape index: {}]   ;;  %s3602_s8 = inlined_call_operand.vmem [shape: f32[1,64], index: 8, kind: input, shape index: {}]   ;;  %s3603_s9 = inlined_call_operand.vmem [shape: f32[64,64], index: 9, kind: input, shape index: {}]   ;;  %s3604_s10 = inlined_call_operand.vmem [shape: f32[1,64], index: 10, kind: input, shape index: {}]   ;;  %s3605_s11 = inlined_call_operand.vmem [shape: f32[64,16], index: 11, kind: input, shape index: {}]   ;;  %s3606_s12 = inlined_call_operand.vmem [shape: f32[1,16], index: 12, kind: input, shape index: {}]   ;;  %s3607_s13 = inlined_call_operand.vmem [shape: f32[256,16], index: 13, kind: output, shape index: {0}]   ;;  %s3608_s14 = inlined_call_operand.hbm [shape: f32[2,1,128], index: 14, kind: output, shape index: {1}]  }
   0x1   :  { %3610 = sst [smem:[#allocation5_spill]] %s3594_s0 }
   0x2   :  { %3611 = sst [smem:[#allocation6_spill]] %s3595_s1 }
   0x3   :  { %3612 = sst [smem:[#allocation7_spill]] %s3596_s2 }
   0x4   :  { %3613 = sst [smem:[#allocation8_spill]] %s3597_s3 }
   0x5   :  { %20 = vsyncpa [#allocation3], 0 }
   0x6   :  { %22 = vsyncpa [#allocation3 + $0x1], 0  ;;  %s2563_s29 = smov 0   ;;  %s2565_s30 = smov 0  }
   0x7   :  { %s2567_s15 = smov 0   ;;  %s2569_s16 = smov 0  }
   0x8 LB: > { %s2584_s17 = sadd.s32 4294967295, %s2484_s16   ;;  %s2059_s18 = sadd.s32 4294967294, %s2484_s16   ;;  %s2484_s16 = sphi %s2569_s16, %s3624_s16   ;;  %s2480_s15 = sphi %s2567_s15, %s3623_s15   ;;  %s2476_s30 = sphi %s2565_s30, %s3622_s30   ;;  %s2472_s29 = sphi %s2563_s29, %s3621_s29  }
   0x9   : > { %s2588_s19 = sadd.s32 1, %s2484_s16   ;;  %s339_s20 = sadd.s32 1, %s2480_s15 }
   0xa   : > { %s336_s21 = ssub.s32 %s2484_s16, %s2588_s19  ;;  %p349_p0 = scmp.ne.s32.totalorder %s2480_s15, %s2476_s30 }
   0xb   : > { %p337_p1 = scmp.eq.s32.totalorder %s336_s21, 0  ;;  %p350_p2 = scmp.eq.s32.totalorder %s2584_s17, 1 }
   0xc   : > { %p355_p3 = scmp.ne.s32.totalorder %s2476_s30, %s2472_s29  ;;  %p356_p4 = scmp.eq.s32.totalorder %s2059_s18, 1 }
   0xd   : > { %s2599_s22 = scalar_select %p337_p1, %s2480_s15, %s339_s20  }
   0xe   : > { %p2601_p5 = por %p350_p2, %p349_p0  ;;  %p2605_p6 = por %p356_p4, %p355_p3 }
   0xf   : > { %p2062_p7 = scmp.ge.s32.totalorder %s2484_s16, 1  ;;  %p419_p8 = scmp.lt.s32.totalorder %s2484_s16, 3 }
  0x11   : > { %p420_p9 = pnand %p2062_p7, %p419_p8 }
  0x12   : > { %s3616_s1 = sld [smem:[#allocation6_spill]] (!%p420_p9)  ;;  %s2063_s27 = sshll.u32 (!%p420_p9), %s2584_s17, 4 }
  0x13   : > { %423 = sbr.rel (%p420_p9) target bundleno = 1339 (0x53b), region = 72  ;;  %p470_p10 = scmp.lt.s32.totalorder (!%p420_p9), %s2063_s27, 31 }
  0x14   : > { %s3617_s0 = sld [smem:[#allocation5_spill]] (!%p420_p9)  ;;  %s2487_s20 = smov (!%p420_p9), 8  }
  0x15   : > { %s3618_s3 = sld [smem:[#allocation8_spill]] (!%p420_p9)  ;;  %s1975_s26 = scalar_lea.hbm (!%p420_p9), %s3608_s14, %s2584_s17 }
  0x16   : > { %s3619_s2 = sld [smem:[#allocation7_spill]] (!%p420_p9) }
  0x18   : > { %v497_v0 = vld [vmem:[%s3616_s1] sm:$0xff]  ;;  %s3626_s27 = smov (!%p470_p10, %s2063_s27), 31  ;;  %vm502_vm0 = vcmask 64512   ;;  %vm644_vm1 = vcmask 523264   ;;  %v781_v62 = vld [vmem:[%s3599_s5 + $0x38] sm:$0xff]  ;;  %v780_v63 = vld [vmem:[%s3599_s5 + $0x30] sm:$0xff] }
  0x19   : > { %566 = vmatpush.msra.mxu0 %v497_v0  ;;  %2165 = vmatpush.msra.mxu1 %v497_v0  ;;  %s3609_s28 = sshll.u32 %s3626_s27, 3  ;;  %v779_v0 = vld [vmem:[%s3599_s5 + $0x28] sm:$0xff]  ;;  %vm1619_vm2 = vcmask 130048   ;;  %vm1897_vm3 = vcmask 130112   ;;  %vm1901_vm4 = vcmask 195712   ;;  %vm1905_vm5 = vcmask 261312  }
  0x1a   : > { %s2623_s21 = scalar_lea.vmem %s3617_s0, %s3609_s28  ;;  %842 = vmatpush.msra.mxu2 %v781_v62  ;;  %s2486_s0 = smov 120   ;;  %vm1909_vm6 = vcmask 326912   ;;  %vm1913_vm7 = vcmask 392512   ;;  %vm1917_vm8 = vcmask 458112   ;;  %vm1921_vm9 = vcmask 523712  }
  0x1b   : > { %v2626_v1 = vld [vmem:[%s2623_s21] sm:$0xff]  ;;  %v2631_v2 = vld [vmem:[%s2623_s21 + $0x8] sm:$0xff]  ;;  %v2636_v3 = vld [vmem:[%s2623_s21 + $0x10] sm:$0xff]  ;;  %vm1925_vm10 = vcmask 589312   ;;  %vm1929_vm11 = vcmask 654912   ;;  %vm1933_vm12 = vcmask 720512  }
  0x1c   : > { %2067 = vmatmul.msk.f32.vlgmr.msra.gmra.mxu0 %vm502_vm0, %v2626_v1  ;;  %v2641_v4 = vld [vmem:[%s2623_s21 + $0x18] sm:$0xff]  ;;  %v2646_v5 = vld [vmem:[%s2623_s21 + $0x20] sm:$0xff]  ;;  %v2651_v6 = vld [vmem:[%s2623_s21 + $0x48] sm:$0xff]  ;;  %843 = vmatpush.msra.mxu2 %v780_v63  ;;  %vm1937_vm13 = vcmask 786112   ;;  %vm1941_vm14 = vcmask 851712   ;;  %vm1945_vm15 = vcmask 917312  }
  0x1d   : > { %v639_v7 = vld [vmem:[%s3618_s3 + $0x38] sm:$0xff]  ;;  %2076 = vmatmul.msk.f32.vlgmr.msra.gmra.mxu1 %vm502_vm0, %v2651_v6  ;;  %v638_v8 = vld [vmem:[%s3618_s3 + $0x30] sm:$0xff]  ;;  %v637_v9 = vld [vmem:[%s3618_s3 + $0x28] sm:$0xff] }
  0x1e   : > { %701 = vmatpush.msrb.mxu1 %v639_v7  ;;  %v2665_v10 = vld [vmem:[%s2623_s21 + $0x28] sm:$0xff]  ;;  %v636_v11 = vld [vmem:[%s3618_s3 + $0x20] sm:$0xff]  ;;  %v2671_v12 = vld [vmem:[%s2623_s21 + $0x50] sm:$0xff]  ;;  %844 = vmatpush.msra.mxu2 %v779_v0 }
  0x1f   : > { %v635_v13 = vld [vmem:[%s3618_s3 + $0x18] sm:$0xff]  ;;  %v634_v14 = vld [vmem:[%s3618_s3 + $0x10] sm:$0xff]  ;;  %v633_v15 = vld [vmem:[%s3618_s3 + $0x8] sm:$0xff] }
  0x20   : > { %702 = vmatpush.msrb.mxu1 %v638_v8  ;;  %v2687_v16 = vld [vmem:[%s2623_s21 + $0x30] sm:$0xff]  ;;  %v2690_v17 = vld [vmem:[%s2623_s21 + $0x58] sm:$0xff]  ;;  %v2700_v19 = vld [vmem:[%s2623_s21 + $0x60] sm:$0xff] }
  0x21   : > { %v2697_v18 = vld [vmem:[%s2623_s21 + $0x38] sm:$0xff]  ;;  %v2707_v20 = vld [vmem:[%s2623_s21 + $0x40] sm:$0xff]  ;;  %v2710_v21 = vld [vmem:[%s2623_s21 + $0x68] sm:$0xff] }
  0x22   : > { %703 = vmatpush.msrb.mxu1 %v637_v9  ;;  %v2717_v22 = vld [vmem:[%s2623_s21 + $0x70] sm:$0xff]  ;;  %v2722_v23 = vld [vmem:[%s2623_s21 + $0x78] sm:$0xff]  ;;  %v632_v24 = vld [vmem:[%s3618_s3] sm:$0xff] }
  0x23   : > { %v2732_v25 = vld [vmem:[%s3619_s2] ss:$0 sm:$0xff] }
  0x24   : > { %2068 = vmatmul.msk.f32.gmra.mxu0 %vm502_vm0, %v2631_v2  ;;  %704 = vmatpush.msrb.mxu1 %v636_v11 }
  0x25   : > { %2077 = vmatmul.msk.f32.gmra.mxu1 %vm502_vm0, %v2671_v12 }
  0x26   : > { %705 = vmatpush.msrb.mxu1 %v635_v13 }
  0x28   : > { %706 = vmatpush.msrb.mxu1 %v634_v14  ;;  %v778_v14 = vld [vmem:[%s3599_s5 + $0x20] sm:$0xff] }
  0x29   : > { %845 = vmatpush.msra.mxu2 %v778_v14 }
  0x2a   : > { %707 = vmatpush.msrb.mxu1 %v633_v15 }
  0x2c   : > { %2069 = vmatmul.msk.f32.gmra.mxu0 %vm502_vm0, %v2636_v3  ;;  %708 = vmatpush.msrb.mxu1 %v632_v24  ;;  %v777_v24 = vld [vmem:[%s3599_s5 + $0x18] sm:$0xff] }
  0x2d   : > { %2078 = vmatmul.msk.f32.gmra.mxu1 %vm502_vm0, %v2690_v17  ;;  %846 = vmatpush.msra.mxu2 %v777_v24 }
  0x34   : > { %2070 = vmatmul.msk.f32.gmra.mxu0 %vm502_vm0, %v2641_v4 }
  0x35   : > { %2079 = vmatmul.msk.f32.gmra.mxu1 %vm502_vm0, %v2700_v19 }
  0x3c   : > { %2071 = vmatmul.msk.f32.gmra.mxu0 %vm502_vm0, %v2646_v5 }
  0x3d   : > { %2080 = vmatmul.msk.f32.gmra.mxu1 %vm502_vm0, %v2710_v21 }
  0x44   : > { %2072 = vmatmul.msk.f32.gmra.mxu0 %vm502_vm0, %v2665_v10 }
  0x45   : > { %2081 = vmatmul.msk.f32.gmra.mxu1 %vm502_vm0, %v2717_v22 }
  0x4c   : > { %2073 = vmatmul.msk.f32.gmra.mxu0 %vm502_vm0, %v2687_v16 }
  0x4d   : > { %2082 = vmatmul.msk.f32.gmra.mxu1 %vm502_vm0, %v2722_v23 }
  0x54   : > { %2074 = vmatmul.msk.f32.gmra.mxu0 %vm502_vm0, %v2697_v18 }
  0x5c   : > { %2075 = vmatmul.msk.f32.gmra.mxu0 %vm502_vm0, %v2707_v20 }
  0x99   : > { %v568_v26 = vpop.f32.mrf.mxu0 }
  0x9a   : > { %v569_v27 = vadd.f32 %v2732_v25, %v568_v26  ;;  %v595_v47 = vpop.f32.mrf.mxu1  ;;  %v776_v26 = vld [vmem:[%s3599_s5 + $0x10] sm:$0xff] }
  0x9b   : > { %v596_v54 = vadd.f32 %v2732_v25, %v595_v47  ;;  %847 = vmatpush.msra.mxu2 %v776_v26 }
  0x9c   : > { %2214 = vtanh.f32 %v569_v27  ;;  %v775_v27 = vld [vmem:[%s3599_s5 + $0x8] sm:$0xff] }
  0x9d   : > { %848 = vmatpush.msra.mxu2 %v775_v27 }
  0xa1   : > { %v571_v28 = vpop.f32.mrf.mxu0 }
  0xa2   : > { %v2215_v29 = vpop.eup %2214  ;;  %v572_v30 = vadd.f32 %v2732_v25, %v571_v28  ;;  %v598_v53 = vpop.f32.mrf.mxu1 }
  0xa3   : > { %2083 = vmatmul.msk.f32.vlgmr.msrb.gmra.mxu1 %vm644_vm1, %v2215_v29  ;;  %v599_v57 = vadd.f32 %v2732_v25, %v598_v53 }
  0xa4   : > { %2216 = vtanh.f32 %v572_v30  ;;  %v774_v30 = vld [vmem:[%s3599_s5] sm:$0xff] }
  0xa5   : > { %849 = vmatpush.msra.mxu2 %v774_v30 }
  0xa9   : > { %v574_v31 = vpop.f32.mrf.mxu0 }
  0xaa   : > { %v2217_v32 = vpop.eup %2216  ;;  %v575_v33 = vadd.f32 %v2732_v25, %v574_v31  ;;  %v601_v56 = vpop.f32.mrf.mxu1 }
  0xab   : > { %2084 = vmatmul.msk.f32.gmra.mxu1 %vm644_vm1, %v2217_v32  ;;  %v602_v59 = vadd.f32 %v2732_v25, %v601_v56 }
  0xac   : > { %2218 = vtanh.f32 %v575_v33 }
  0xb1   : > { %v577_v34 = vpop.f32.mrf.mxu0 }
  0xb2   : > { %v2219_v35 = vpop.eup %2218  ;;  %v578_v36 = vadd.f32 %v2732_v25, %v577_v34  ;;  %v604_v60 = vpop.f32.mrf.mxu1 }
  0xb3   : > { %2085 = vmatmul.msk.f32.gmra.mxu1 %vm644_vm1, %v2219_v35  ;;  %v605_v7 = vadd.f32 %v2732_v25, %v604_v60  ;;  %v2793_v35 = vld [vmem:[%s3598_s4] ss:$0 sm:$0xff] }
  0xb4   : > { %2220 = vtanh.f32 %v578_v36 }
  0xb9   : > { %v580_v37 = vpop.f32.mrf.mxu0 }
  0xba   : > { %v2221_v38 = vpop.eup %2220  ;;  %v581_v39 = vadd.f32 %v2732_v25, %v580_v37  ;;  %v607_v9 = vpop.f32.mrf.mxu1 }
  0xbb   : > { %2086 = vmatmul.msk.f32.gmra.mxu1 %vm644_vm1, %v2221_v38  ;;  %v608_v11 = vadd.f32 %v2732_v25, %v607_v9 }
  0xbc   : > { %2222 = vtanh.f32 %v581_v39 }
  0xc1   : > { %v583_v40 = vpop.f32.mrf.mxu0 }
  0xc2   : > { %v2223_v41 = vpop.eup %2222  ;;  %v584_v42 = vadd.f32 %v2732_v25, %v583_v40  ;;  %v610_v15 = vpop.f32.mrf.mxu1 }
  0xc3   : > { %2087 = vmatmul.msk.f32.gmra.mxu1 %vm644_vm1, %v2223_v41  ;;  %v611_v28 = vadd.f32 %v2732_v25, %v610_v15 }
  0xc4   : > { %2224 = vtanh.f32 %v584_v42 }
  0xc9   : > { %v586_v43 = vpop.f32.mrf.mxu0 }
  0xca   : > { %v2225_v44 = vpop.eup %2224  ;;  %v587_v45 = vadd.f32 %v2732_v25, %v586_v43  ;;  %v613_v31 = vpop.f32.mrf.mxu1 }
  0xcb   : > { %2088 = vmatmul.msk.f32.gmra.mxu1 %vm644_vm1, %v2225_v44  ;;  %v614_v32 = vadd.f32 %v2732_v25, %v613_v31 }
  0xcc   : > { %2226 = vtanh.f32 %v587_v45 }
  0xd1   : > { %v589_v46 = vpop.f32.mrf.mxu0 }
  0xd2   : > { %v2227_v48 = vpop.eup %2226  ;;  %v590_v49 = vadd.f32 %v2732_v25, %v589_v46 }
  0xd3   : > { %2089 = vmatmul.msk.f32.gmra.mxu1 %vm644_vm1, %v2227_v48 }
  0xd4   : > { %2228 = vtanh.f32 %v590_v49 }
  0xd9   : > { %v592_v50 = vpop.f32.mrf.mxu0 }
  0xda   : > { %v2229_v51 = vpop.eup %2228  ;;  %v593_v52 = vadd.f32 %v2732_v25, %v592_v50 }
  0xdb   : > { %2090 = vmatmul.msk.f32.gmra.mxu1 %vm644_vm1, %v2229_v51 }
  0xdc   : > { %2230 = vtanh.f32 %v593_v52 }
  0xdd   : > { %2232 = vtanh.f32 %v596_v54 }
  0xde   : > { %2234 = vtanh.f32 %v599_v57 }
  0xdf   : > { %2236 = vtanh.f32 %v602_v59 }
  0xe0   : > { %2238 = vtanh.f32 %v605_v7 }
  0xe1   : > { %2240 = vtanh.f32 %v608_v11 }
  0xe2   : > { %v2231_v55 = vpop.eup %2230  ;;  %2242 = vtanh.f32 %v611_v28 }
  0xe3   : > { %2091 = vmatmul.msk.f32.gmra.mxu1 %vm644_vm1, %v2231_v55  ;;  %v2233_v58 = vpop.eup %2232  ;;  %2244 = vtanh.f32 %v614_v32  ;;  %v1027_v32 = vld [vmem:[%s3601_s7] sm:$0xff] }
  0xe4   : > { %v2235_v61 = vpop.eup %2234  ;;  %1095 = vmatpush.msrb.mxu2 %v1027_v32  ;;  %2166 = vmatpush.msra.mxu3 %v1027_v32 }
  0xe5   : > { %v2237_v8 = vpop.eup %2236 }
  0xe6   : > { %v2239_v13 = vpop.eup %2238 }
  0xe7   : > { %v2241_v29 = vpop.eup %2240 }
  0xe8   : > { %v2243_v33 = vpop.eup %2242 }
  0xe9   : > { %v2245_v34 = vpop.eup %2244 }
  0xeb   : > { %2092 = vmatmul.msk.f32.gmra.mxu1 %vm644_vm1, %v2233_v58 }
  0xf3   : > { %2093 = vmatmul.msk.f32.gmra.mxu1 %vm644_vm1, %v2235_v61 }
  0xfb   : > { %2094 = vmatmul.msk.f32.gmra.mxu1 %vm644_vm1, %v2237_v8 }
 0x103   : > { %2095 = vmatmul.msk.f32.gmra.mxu1 %vm644_vm1, %v2239_v13 }
 0x10b   : > { %2096 = vmatmul.msk.f32.gmra.mxu1 %vm644_vm1, %v2241_v29 }
 0x113   : > { %2097 = vmatmul.msk.f32.gmra.mxu1 %vm644_vm1, %v2243_v33 }
 0x11b   : > { %2098 = vmatmul.msk.f32.gmra.mxu1 %vm644_vm1, %v2245_v34 }
 0x120   : > { %v710_v36 = vpop.f32.mrf.mxu1 }
 0x121   : > { %v711_v37 = vadd.f32 %v2793_v35, %v710_v36 }
 0x123   : > { %2246 = vtanh.f32 %v711_v37 }
 0x128   : > { %v713_v38 = vpop.f32.mrf.mxu1 }
 0x129   : > { %v2247_v39 = vpop.eup %2246  ;;  %v714_v25 = vadd.f32 %v2793_v35, %v713_v38  ;;  %v2833_v38 = vld [vmem:[%s3600_s6] ss:$0 sm:$0xff] }
 0x12a   : > { %2099 = vmatmul.msk.f32.vlgmr.msra.gmra.mxu2 %vm644_vm1, %v2247_v39 }
 0x12b   : > { %2248 = vtanh.f32 %v714_v25 }
 0x130   : > { %v716_v40 = vpop.f32.mrf.mxu1 }
 0x131   : > { %v2249_v41 = vpop.eup %2248  ;;  %v717_v42 = vadd.f32 %v2793_v35, %v716_v40 }
 0x132   : > { %2100 = vmatmul.msk.f32.gmra.mxu2 %vm644_vm1, %v2249_v41 }
 0x133   : > { %2250 = vtanh.f32 %v717_v42 }
 0x138   : > { %v719_v43 = vpop.f32.mrf.mxu1 }
 0x139   : > { %v2251_v44 = vpop.eup %2250  ;;  %v720_v45 = vadd.f32 %v2793_v35, %v719_v43 }
 0x13a   : > { %2101 = vmatmul.msk.f32.gmra.mxu2 %vm644_vm1, %v2251_v44 }
 0x13b   : > { %2252 = vtanh.f32 %v720_v45 }
 0x140   : > { %v722_v46 = vpop.f32.mrf.mxu1 }
 0x141   : > { %v2253_v47 = vpop.eup %2252  ;;  %v723_v48 = vadd.f32 %v2793_v35, %v722_v46 }
 0x142   : > { %2102 = vmatmul.msk.f32.gmra.mxu2 %vm644_vm1, %v2253_v47 }
 0x143   : > { %2254 = vtanh.f32 %v723_v48 }
 0x148   : > { %v725_v49 = vpop.f32.mrf.mxu1 }
 0x149   : > { %v2255_v50 = vpop.eup %2254  ;;  %v726_v51 = vadd.f32 %v2793_v35, %v725_v49 }
 0x14a   : > { %2103 = vmatmul.msk.f32.gmra.mxu2 %vm644_vm1, %v2255_v50 }
 0x14b   : > { %2256 = vtanh.f32 %v726_v51 }
 0x150   : > { %v728_v52 = vpop.f32.mrf.mxu1 }
 0x151   : > { %v2257_v53 = vpop.eup %2256  ;;  %v729_v54 = vadd.f32 %v2793_v35, %v728_v52 }
 0x152   : > { %2104 = vmatmul.msk.f32.gmra.mxu2 %vm644_vm1, %v2257_v53 }
 0x153   : > { %2258 = vtanh.f32 %v729_v54 }
 0x158   : > { %v731_v55 = vpop.f32.mrf.mxu1 }
 0x159   : > { %v2259_v56 = vpop.eup %2258  ;;  %v732_v57 = vadd.f32 %v2793_v35, %v731_v55 }
 0x15a   : > { %2105 = vmatmul.msk.f32.gmra.mxu2 %vm644_vm1, %v2259_v56 }
 0x15b   : > { %2260 = vtanh.f32 %v732_v57 }
 0x160   : > { %v734_v58 = vpop.f32.mrf.mxu1 }
 0x161   : > { %v2261_v59 = vpop.eup %2260  ;;  %v735_v60 = vadd.f32 %v2793_v35, %v734_v58 }
 0x162   : > { %2106 = vmatmul.msk.f32.gmra.mxu2 %vm644_vm1, %v2261_v59 }
 0x163   : > { %2262 = vtanh.f32 %v735_v60 }
 0x168   : > { %v737_v61 = vpop.f32.mrf.mxu1 }
 0x169   : > { %v2263_v62 = vpop.eup %2262  ;;  %v738_v63 = vadd.f32 %v2793_v35, %v737_v61 }
 0x16a   : > { %2107 = vmatmul.msk.f32.gmra.mxu2 %vm644_vm1, %v2263_v62 }
 0x16b   : > { %2264 = vtanh.f32 %v738_v63 }
 0x170   : > { %v740_v0 = vpop.f32.mrf.mxu1 }
 0x171   : > { %v2265_v7 = vpop.eup %2264  ;;  %v741_v8 = vadd.f32 %v2793_v35, %v740_v0 }
 0x172   : > { %2108 = vmatmul.msk.f32.gmra.mxu2 %vm644_vm1, %v2265_v7 }
 0x173   : > { %2266 = vtanh.f32 %v741_v8 }
 0x178   : > { %v743_v9 = vpop.f32.mrf.mxu1 }
 0x179   : > { %v2267_v11 = vpop.eup %2266  ;;  %v744_v13 = vadd.f32 %v2793_v35, %v743_v9 }
 0x17a   : > { %2109 = vmatmul.msk.f32.gmra.mxu2 %vm644_vm1, %v2267_v11 }
 0x17b   : > { %2268 = vtanh.f32 %v744_v13 }
 0x180   : > { %v746_v14 = vpop.f32.mrf.mxu1 }
 0x181   : > { %v2269_v15 = vpop.eup %2268  ;;  %v747_v24 = vadd.f32 %v2793_v35, %v746_v14 }
 0x182   : > { %2110 = vmatmul.msk.f32.gmra.mxu2 %vm644_vm1, %v2269_v15 }
 0x183   : > { %2270 = vtanh.f32 %v747_v24 }
 0x188   : > { %v749_v26 = vpop.f32.mrf.mxu1 }
 0x189   : > { %v2271_v27 = vpop.eup %2270  ;;  %v750_v28 = vadd.f32 %v2793_v35, %v749_v26 }
 0x18a   : > { %2111 = vmatmul.msk.f32.gmra.mxu2 %vm644_vm1, %v2271_v27 }
 0x18b   : > { %2272 = vtanh.f32 %v750_v28 }
 0x190   : > { %v752_v29 = vpop.f32.mrf.mxu1 }
 0x191   : > { %v2273_v30 = vpop.eup %2272  ;;  %v753_v31 = vadd.f32 %v2793_v35, %v752_v29 }
 0x192   : > { %2112 = vmatmul.msk.f32.gmra.mxu2 %vm644_vm1, %v2273_v30 }
 0x193   : > { %2274 = vtanh.f32 %v753_v31 }
 0x198   : > { %v755_v33 = vpop.f32.mrf.mxu1 }
 0x199   : > { %v2275_v34 = vpop.eup %2274  ;;  %v756_v36 = vadd.f32 %v2793_v35, %v755_v33 }
 0x19a   : > { %2113 = vmatmul.msk.f32.gmra.mxu2 %vm644_vm1, %v2275_v34 }
 0x19b   : > { %2276 = vtanh.f32 %v756_v36 }
 0x1a1   : > { %v2277_v37 = vpop.eup %2276 }
 0x1a2   : > { %2114 = vmatmul.msk.f32.gmra.mxu2 %vm644_vm1, %v2277_v37 }
 0x1ad   : > { %v851_v39 = vpop.f32.mrf.mxu2 }
 0x1ae   : > { %v2836_v25 = vadd.f32 %v2833_v38, %v851_v39 }
 0x1b0   : > { %v899_v40 = vmul.f32 1.442695, %v2836_v25 }
 0x1b2   : > { %2278 = vpow2.f32 %v899_v40 }
 0x1b5   : > { %v854_v41 = vpop.f32.mrf.mxu2 }
 0x1b6   : > { %v2840_v35 = vadd.f32 %v2833_v38, %v854_v41 }
 0x1b8   : > { %v2279_v42 = vpop.eup %2278  ;;  %v901_v43 = vmul.f32 1.442695, %v2840_v35 }
 0x1b9   : > { %v931_v44 = vmul.f32 %v2279_v42, %v2626_v1 }
 0x1ba   : > { %2280 = vpow2.f32 %v901_v43 }
 0x1bb   : > { %963 = vrot.lane.b32.xlu0 %v931_v44, %s2486_s0 }
 0x1bd   : > { %v857_v45 = vpop.f32.mrf.mxu2 }
 0x1be   : > { %v2846_v46 = vadd.f32 %v2833_v38, %v857_v45 }
 0x1c0   : > { %v2281_v47 = vpop.eup %2280  ;;  %v903_v48 = vmul.f32 1.442695, %v2846_v46 }
 0x1c1   : > { %v932_v49 = vmul.f32 %v2281_v47, %v2631_v2 }
 0x1c2   : > { %2282 = vpow2.f32 %v903_v48 }
 0x1c3   : > { %965 = vrot.lane.b32.xlu0 %v932_v49, %s2486_s0 }
 0x1c5   : > { %v860_v50 = vpop.f32.mrf.mxu2 }
 0x1c6   : > { %v2852_v51 = vadd.f32 %v2833_v38, %v860_v50 }
 0x1c8   : > { %v2283_v1 = vpop.eup %2282  ;;  %v905_v52 = vmul.f32 1.442695, %v2852_v51 }
 0x1c9   : > { %v933_v53 = vmul.f32 %v2283_v1, %v2636_v3 }
 0x1ca   : > { %2284 = vpow2.f32 %v905_v52 }
 0x1cb   : > { %967 = vrot.lane.b32.xlu1 %v933_v53, %s2486_s0 }
 0x1cd   : > { %v863_v54 = vpop.f32.mrf.mxu2 }
 0x1ce   : > { %v2858_v55 = vadd.f32 %v2833_v38, %v863_v54 }
 0x1d0   : > { %v2285_v2 = vpop.eup %2284  ;;  %v907_v56 = vmul.f32 1.442695, %v2858_v55 }
 0x1d1   : > { %v934_v57 = vmul.f32 %v2285_v2, %v2641_v4 }
 0x1d2   : > { %2286 = vpow2.f32 %v907_v56 }
 0x1d3   : > { %969 = vrot.lane.b32.xlu1 %v934_v57, %s2486_s0 }
 0x1d5   : > { %v866_v58 = vpop.f32.mrf.mxu2 }
 0x1d6   : > { %v2864_v59 = vadd.f32 %v2833_v38, %v866_v58 }
 0x1d8   : > { %v2287_v3 = vpop.eup %2286  ;;  %v909_v60 = vmul.f32 1.442695, %v2864_v59 }
 0x1d9   : > { %v935_v61 = vmul.f32 %v2287_v3, %v2646_v5 }
 0x1da   : > { %2288 = vpow2.f32 %v909_v60 }
 0x1db   : > { %971 = vrot.lane.b32.xlu2 %v935_v61, %s2486_s0 }
 0x1dd   : > { %v869_v62 = vpop.f32.mrf.mxu2 }
 0x1de   : > { %v2870_v63 = vadd.f32 %v2833_v38, %v869_v62 }
 0x1e0   : > { %v2289_v4 = vpop.eup %2288  ;;  %v911_v0 = vmul.f32 1.442695, %v2870_v63 }
 0x1e1   : > { %v936_v7 = vmul.f32 %v2289_v4, %v2665_v10 }
 0x1e2   : > { %2290 = vpow2.f32 %v911_v0 }
 0x1e3   : > { %973 = vrot.lane.b32.xlu2 %v936_v7, %s2486_s0 }
 0x1e5   : > { %v872_v8 = vpop.f32.mrf.mxu2 }
 0x1e6   : > { %v2876_v9 = vadd.f32 %v2833_v38, %v872_v8 }
 0x1e8   : > { %v2291_v5 = vpop.eup %2290  ;;  %v913_v11 = vmul.f32 1.442695, %v2876_v9 }
 0x1e9   : > { %v937_v13 = vmul.f32 %v2291_v5, %v2687_v16 }
 0x1ea   : > { %2292 = vpow2.f32 %v913_v11 }
 0x1eb   : > { %975 = vrot.lane.b32.xlu0 %v937_v13, %s2486_s0 }
 0x1ed   : > { %v875_v14 = vpop.f32.mrf.mxu2 }
 0x1ee   : > { %v2882_v15 = vadd.f32 %v2833_v38, %v875_v14 }
 0x1f0   : > { %v2293_v10 = vpop.eup %2292  ;;  %v915_v24 = vmul.f32 1.442695, %v2882_v15 }
 0x1f1   : > { %v938_v26 = vmul.f32 %v2293_v10, %v2697_v18 }
 0x1f2   : > { %2294 = vpow2.f32 %v915_v24  ;;  %v1166_v24 = vld [vmem:[%s3603_s9 + $0x28] sm:$0xff] }
 0x1f3   : > { %977 = vrot.lane.b32.xlu1 %v938_v26, %s2486_s0  ;;  %1652 = vrot.lane.b32.xlu0 %v2836_v25, %s2486_s0 }
 0x1f5   : > { %v878_v27 = vpop.f32.mrf.mxu2 }
 0x1f6   : > { %v2890_v16 = vadd.f32 %v2833_v38, %v878_v27 }
 0x1f8   : > { %v2295_v28 = vpop.eup %2294  ;;  %v917_v29 = vmul.f32 1.442695, %v2890_v16 }
 0x1f9   : > { %v939_v30 = vmul.f32 %v2295_v28, %v2707_v20 }
 0x1fa   : > { %2296 = vpow2.f32 %v917_v29 }
 0x1fb   : > { %979 = vrot.lane.b32.xlu2 %v939_v30, %s2486_s0 }
 0x1fd   : > { %v881_v31 = vpop.f32.mrf.mxu2 }
 0x1fe   : > { %v2896_v18 = vadd.f32 %v2833_v38, %v881_v31 }
 0x200   : > { %v2297_v32 = vpop.eup %2296  ;;  %v919_v33 = vmul.f32 1.442695, %v2896_v18 }
 0x201   : > { %v940_v34 = vmul.f32 %v2297_v32, %v2651_v6 }
 0x202   : > { %2298 = vpow2.f32 %v919_v33 }
 0x203   : > { %1656 = vrot.lane.b32.xlu2 %v2846_v46, %s2486_s0  ;;  %981 = vrot.lane.b32.xlu0 %v940_v34, %s2486_s0 }
 0x205   : > { %v884_v36 = vpop.f32.mrf.mxu2 }
 0x206   : > { %v2904_v20 = vadd.f32 %v2833_v38, %v884_v36 }
 0x208   : > { %v2299_v37 = vpop.eup %2298  ;;  %v921_v39 = vmul.f32 1.442695, %v2904_v20 }
 0x209   : > { %v941_v40 = vmul.f32 %v2299_v37, %v2671_v12 }
 0x20a   : > { %2300 = vpow2.f32 %v921_v39 }
 0x20b   : > { %1662 = vrot.lane.b32.xlu2 %v2864_v59, %s2486_s0  ;;  %983 = vrot.lane.b32.xlu1 %v941_v40, %s2486_s0 }
 0x20c   : > { %1658 = vrot.lane.b32.xlu0 %v2852_v51, %s2486_s0 }
 0x20d   : > { %v887_v6 = vpop.f32.mrf.mxu2 }
 0x20e   : > { %v2914_v41 = vadd.f32 %v2833_v38, %v887_v6 }
 0x210   : > { %v2301_v42 = vpop.eup %2300  ;;  %v923_v43 = vmul.f32 1.442695, %v2914_v41 }
 0x211   : > { %v942_v44 = vmul.f32 %v2301_v42, %v2690_v17 }
 0x212   : > { %2302 = vpow2.f32 %v923_v43 }
 0x213   : > { %985 = vrot.lane.b32.xlu2 %v942_v44, %s2486_s0  ;;  %1654 = vrot.lane.b32.xlu1 %v2840_v35, %s2486_s0  ;;  %v1162_v44 = vld [vmem:[%s3603_s9 + $0x8] sm:$0xff] }
 0x214   : > { %1664 = vrot.lane.b32.xlu0 %v2870_v63, %s2486_s0 }
 0x215   : > { %v890_v12 = vpop.f32.mrf.mxu2 }
 0x216   : > { %v2924_v45 = vadd.f32 %v2833_v38, %v890_v12 }
 0x218   : > { %v2303_v47 = vpop.eup %2302  ;;  %v925_v48 = vmul.f32 1.442695, %v2924_v45 }
 0x219   : > { %v943_v49 = vmul.f32 %v2303_v47, %v2700_v19 }
 0x21a   : > { %2304 = vpow2.f32 %v925_v48 }
 0x21b   : > { %1668 = vrot.lane.b32.xlu2 %v2882_v15, %s2486_s0  ;;  %1660 = vrot.lane.b32.xlu1 %v2858_v55, %s2486_s0 }
 0x21c   : > { %987 = vrot.lane.b32.xlu0 %v943_v49, %s2486_s0 }
 0x21d   : > { %v893_v17 = vpop.f32.mrf.mxu2 }
 0x21e   : > { %v2934_v50 = vadd.f32 %v2833_v38, %v893_v17 }
 0x220   : > { %v2305_v1 = vpop.eup %2304  ;;  %v927_v53 = vmul.f32 1.442695, %v2934_v50 }
 0x221   : > { %v944_v52 = vmul.f32 %v2305_v1, %v2710_v21 }
 0x222   : > { %2306 = vpow2.f32 %v927_v53 }
 0x223   : > { %1674 = vrot.lane.b32.xlu2 %v2904_v20, %s2486_s0  ;;  %989 = vrot.lane.b32.xlu1 %v944_v52, %s2486_s0 }
 0x224   : > { %1670 = vrot.lane.b32.xlu0 %v2890_v16, %s2486_s0 }
 0x225   : > { %v896_v19 = vpop.f32.mrf.mxu2 }
 0x226   : > { %v2944_v54 = vadd.f32 %v2833_v38, %v896_v19 }
 0x228   : > { %v929_v21 = vmul.f32 1.442695, %v2944_v54  ;;  %v2307_v2 = vpop.eup %2306 }
 0x229   : > { %v945_v38 = vmul.f32 %v2307_v2, %v2717_v22 }
 0x22a   : > { %2308 = vpow2.f32 %v929_v21 }
 0x22b   : > { %1680 = vrot.lane.b32.xlu2 %v2934_v50, %s2486_s0  ;;  %1666 = vrot.lane.b32.xlu1 %v2876_v9, %s2486_s0 }
 0x22c   : > { %1676 = vrot.lane.b32.xlu0 %v2914_v41, %s2486_s0 }
 0x22d   : > { %v964_v56 = vpop.permute.xlu0 %963 }
 0x22e   : > { %v2954_v57 = vadd.f32 %v964_v56, %v2836_v25 }
 0x230   : > { %2115 = vmatmul.msk.f32.vlgmr.msrb.gmra.mxu2 %vm502_vm0, %v2954_v57  ;;  %v2309_v58 = vpop.eup %2308 }
 0x231   : > { %v946_v25 = vmul.f32 %v2309_v58, %v2722_v23 }
 0x233   : > { %991 = vrot.lane.b32.xlu2 %v945_v38, %s2486_s0  ;;  %1672 = vrot.lane.b32.xlu1 %v2896_v18, %s2486_s0 }
 0x234   : > { %1682 = vrot.lane.b32.xlu0 %v2944_v54, %s2486_s0 }
 0x235   : > { %v966_v3 = vpop.permute.xlu0 %965  ;;  %v972_v62 = vpop.permute.xlu2 %971 }
 0x236   : > { %v1012_v60 = vadd.f32 %v966_v3, %v2840_v35  ;;  %v1015_v23 = vadd.f32 %v972_v62, %v2858_v55 }
 0x238   : > { %2116 = vmatmul.msk.f32.gmra.mxu2 %vm502_vm0, %v1012_v60 }
 0x23b   : > { %1678 = vrot.lane.b32.xlu1 %v2924_v45, %s2486_s0 }
 0x23c   : > { %993 = vrot.lane.b32.xlu0 %v946_v25, %s2486_s0 }
 0x23d   : > { %v968_v22 = vpop.permute.xlu1 %967  ;;  %v974_v35 = vpop.permute.xlu2 %973 }
 0x23e   : > { %v1013_v61 = vadd.f32 %v968_v22, %v2846_v46  ;;  %v2980_v7 = vadd.f32 %v974_v35, %v2864_v59  ;;  %v1168_v46 = vld [vmem:[%s3603_s9 + $0x38] sm:$0xff]  ;;  %v1167_v59 = vld [vmem:[%s3603_s9 + $0x30] sm:$0xff] }
 0x23f   : > { %1229 = vmatpush.msrb.mxu0 %v1168_v46 }
 0x240   : > { %2117 = vmatmul.msk.f32.gmra.mxu2 %vm502_vm0, %v1013_v61 }
 0x241   : > { %1230 = vmatpush.msrb.mxu0 %v1167_v59 }
 0x243   : > { %1231 = vmatpush.msrb.mxu0 %v1166_v24 }
 0x245   : > { %v970_v4 = vpop.permute.xlu1 %969 }
 0x246   : > { %v2973_v0 = vadd.f32 %v970_v4, %v2852_v51 }
 0x248   : > { %2118 = vmatmul.msk.f32.gmra.mxu2 %vm502_vm0, %v2973_v0 }
 0x250   : > { %2119 = vmatmul.msk.f32.gmra.mxu2 %vm502_vm0, %v1015_v23 }
 0x255   : > { %v980_v8 = vpop.permute.xlu2 %979 }
 0x256   : > { %v3008_v27 = vadd.f32 %v980_v8, %v2882_v15  ;;  %v1164_v15 = vld [vmem:[%s3603_s9 + $0x18] sm:$0xff] }
 0x258   : > { %2120 = vmatmul.msk.f32.gmra.mxu2 %vm502_vm0, %v2980_v7 }
 0x25d   : > { %v976_v51 = vpop.permute.xlu0 %975  ;;  %v1657_v55 = vpop.permute.xlu2 %1656 }
 0x25e   : > { %v2988_v5 = vadd.f32 %v976_v51, %v2870_v63  ;;  %v1706_v13 = vsel %vm502_vm0, %v1657_v55, 0.0  ;;  %v1309_v51 = vld [vmem:[%s3605_s11 + $0x38] sm:$0xff] }
 0x25f   : > { %1370 = vmatpush.msrb.mxu3 %v1309_v51 }
 0x260   : > { %2121 = vmatmul.msk.f32.gmra.mxu2 %vm502_vm0, %v2988_v5 }
 0x265   : > { %v978_v11 = vpop.permute.xlu1 %977  ;;  %v1653_v10 = vpop.permute.xlu0 %1652 }
 0x266   : > { %v2997_v14 = vadd.f32 %v978_v11, %v2876_v9  ;;  %1707 = vadd.xlane.f32.xlu0 %v1706_v13  ;;  %v1700_v63 = vsel %vm502_vm0, %v1653_v10, 0.0  ;;  %v3005_v26 = vpop.permute.xlu2 %1662  ;;  %v1165_v9 = vld [vmem:[%s3603_s9 + $0x20] sm:$0xff]  ;;  %v1308_v13 = vld [vmem:[%s3605_s11 + $0x30] sm:$0xff] }
 0x267   : > { %1701 = vadd.xlane.f32.xlu1 %v1700_v63  ;;  %1232 = vmatpush.msrb.mxu0 %v1165_v9 }
 0x268   : > { %2122 = vmatmul.msk.f32.vlgmr.msra.gmra.mxu3 %vm502_vm0, %v2997_v14 }
 0x269   : > { %1233 = vmatpush.msrb.mxu0 %v1164_v15  ;;  %1371 = vmatpush.msrb.mxu3 %v1308_v13 }
 0x26e   : > { %v986_v28 = vpop.permute.xlu2 %985 }
 0x26f   : > { %v3037_v37 = vadd.f32 %v986_v28, %v2904_v20  ;;  %v1307_v28 = vld [vmem:[%s3605_s11 + $0x28] sm:$0xff] }
 0x270   : > { %2123 = vmatmul.msk.f32.gmra.mxu3 %vm502_vm0, %v3008_v27 }
 0x271   : > { %1372 = vmatpush.msrb.mxu3 %v1307_v28 }
 0x275   : > { %v982_v29 = vpop.permute.xlu0 %981 }
 0x276   : > { %v3016_v30 = vadd.f32 %v982_v29, %v2890_v16  ;;  %v3024_v32 = vpop.permute.xlu2 %1668  ;;  %v1163_v16 = vld [vmem:[%s3603_s9 + $0x10] sm:$0xff] }
 0x277   : > { %1234 = vmatpush.msrb.mxu0 %v1163_v16 }
 0x278   : > { %2124 = vmatmul.msk.f32.gmra.mxu3 %vm502_vm0, %v3016_v30 }
 0x279   : > { %1235 = vmatpush.msrb.mxu0 %v1162_v44  ;;  %v1305_v44 = vld [vmem:[%s3605_s11 + $0x18] sm:$0xff] }
 0x27a   : > { %1557 = vrot.lane.b32.xlu0 %v1012_v60, %s2487_s20 }
 0x27d   : > { %v984_v31 = vpop.permute.xlu1 %983 }
 0x27e   : > { %v3027_v33 = vadd.f32 %v984_v31, %v2896_v18  ;;  %v1659_v34 = vpop.permute.xlu0 %1658  ;;  %v3040_v40 = vpop.permute.xlu2 %1674 }
 0x27f   : > { %v1709_v25 = vsel %vm502_vm0, %v1659_v34, 0.0  ;;  %v1306_v34 = vld [vmem:[%s3605_s11 + $0x20] sm:$0xff] }
 0x280   : > { %2125 = vmatmul.msk.f32.gmra.mxu3 %vm502_vm0, %v3027_v33  ;;  %1559 = vrot.lane.b32.xlu1 %v1013_v61, %s2487_s20 }
 0x281   : > { %1373 = vmatpush.msrb.mxu3 %v1306_v34 }
 0x282   : > { %1563 = vrot.lane.b32.xlu0 %v1015_v23, %s2487_s20 }
 0x283   : > { %1374 = vmatpush.msrb.mxu3 %v1305_v44  ;;  %v1733_v44 = vsel %vm502_vm0, %v3040_v40, 0.0 }
 0x285   : > { %v1655_v36 = vpop.permute.xlu1 %1654 }
 0x286   : > { %v1665_v39 = vpop.permute.xlu0 %1664  ;;  %v1703_v18 = vsel %vm502_vm0, %v1655_v36, 0.0  ;;  %v3052_v20 = vpop.permute.xlu2 %1680 }
 0x287   : > { %1704 = vadd.xlane.f32.xlu2 %v1703_v18  ;;  %v1718_v53 = vsel %vm502_vm0, %v1665_v39, 0.0 }
 0x288   : > { %2126 = vmatmul.msk.f32.gmra.mxu3 %vm502_vm0, %v3037_v37 }
 0x28d   : > { %v1661_v6 = vpop.permute.xlu1 %1660 }
 0x28e   : > { %v988_v42 = vpop.permute.xlu0 %987  ;;  %v992_v49 = vpop.permute.xlu2 %991  ;;  %v1712_v52 = vsel %vm502_vm0, %v1661_v6, 0.0 }
 0x28f   : > { %v3045_v43 = vadd.f32 %v988_v42, %v2914_v41  ;;  %v1161_v41 = vld [vmem:[%s3603_s9] sm:$0xff]  ;;  %v3065_v1 = vadd.f32 %v992_v49, %v2934_v50 }
 0x290   : > { %1236 = vmatpush.msrb.mxu0 %v1161_v41  ;;  %v3081_v50 = vld [vmem:[%s3602_s8] ss:$0 sm:$0xff] }
 0x291   : > { %2127 = vmatmul.msk.f32.gmra.mxu3 %vm502_vm0, %v3045_v43 }
 0x295   : > { %v990_v12 = vpop.permute.xlu1 %989 }
 0x296   : > { %v3055_v47 = vadd.f32 %v990_v12, %v2924_v45  ;;  %v1671_v48 = vpop.permute.xlu0 %1670  ;;  %v1715_v12 = vsel %vm502_vm0, %v3005_v26, 0.0  ;;  %v1303_v26 = vld [vmem:[%s3605_s11 + $0x8] sm:$0xff] }
 0x299   : > { %2128 = vmatmul.msk.f32.gmra.mxu3 %vm502_vm0, %v3055_v47 }
 0x29d   : > { %v1667_v10 = vpop.permute.xlu1 %1666 }
 0x29e   : > { %v3062_v17 = vpop.permute.xlu0 %1676  ;;  %v1721_v9 = vsel %vm502_vm0, %v1667_v10, 0.0 }
 0x29f   : > { %1555 = vrot.lane.b32.xlu2 %v2954_v57, %s2487_s20 }
 0x2a1   : > { %2129 = vmatmul.msk.f32.gmra.mxu3 %vm502_vm0, %v3065_v1 }
 0x2a6   : > { %v3071_v45 = vpop.permute.xlu0 %1682 }
 0x2aa   : > { %1713 = vadd.xlane.f32.xlu1 %v1712_v52 }
 0x2ac   : > { %1719 = vadd.xlane.f32.xlu0 %v1718_v53 }
 0x2ae   : > { %v994_v19 = vpop.permute.xlu0 %993 }
 0x2af   : > { %v3076_v21 = vadd.f32 %v994_v19, %v2944_v54 }
 0x2b1   : > { %2130 = vmatmul.msk.f32.gmra.mxu3 %vm502_vm0, %v3076_v21 }
 0x2b3   : > { %v1097_v2 = vpop.f32.mrf.mxu2 }
 0x2b4   : > { %v1098_v56 = vadd.f32 %v3081_v50, %v1097_v2 }
 0x2b6   : > { %2310 = vtanh.f32 %v1098_v56 }
 0x2bb   : > { %v1100_v57 = vpop.f32.mrf.mxu2 }
 0x2bc   : > { %v2311_v38 = vpop.eup %2310  ;;  %v1101_v58 = vadd.f32 %v3081_v50, %v1100_v57  ;;  %v1302_v57 = vld [vmem:[%s3605_s11] sm:$0xff] }
 0x2bd   : > { %2131 = vmatmul.msk.f32.vlgmr.msrb.gmra.mxu0 %vm644_vm1, %v2311_v38 }
 0x2be   : > { %2312 = vtanh.f32 %v1101_v58 }
 0x2c0   : > { %1569 = vrot.lane.b32.xlu0 %v2997_v14, %s2487_s20  ;;  %v1727_v14 = vsel %vm502_vm0, %v1671_v48, 0.0 }
 0x2c3   : > { %v1103_v54 = vpop.f32.mrf.mxu2  ;;  %1565 = vrot.lane.b32.xlu1 %v2980_v7, %s2487_s20 }
 0x2c4   : > { %v2313_v3 = vpop.eup %2312  ;;  %v1104_v60 = vadd.f32 %v3081_v50, %v1103_v54 }
 0x2c5   : > { %2132 = vmatmul.msk.f32.gmra.mxu0 %vm644_vm1, %v2313_v3  ;;  %v1736_v3 = vsel %vm502_vm0, %v3062_v17, 0.0 }
 0x2c6   : > { %2314 = vtanh.f32 %v1104_v60 }
 0x2c8   : > { %1710 = vadd.xlane.f32.xlu2 %v1709_v25  ;;  %v1673_v25 = vpop.permute.xlu1 %1672 }
 0x2cb   : > { %v1106_v22 = vpop.f32.mrf.mxu2 }
 0x2cc   : > { %v2315_v61 = vpop.eup %2314  ;;  %v1107_v62 = vadd.f32 %v3081_v50, %v1106_v22  ;;  %v1730_v22 = vsel %vm502_vm0, %v1673_v25, 0.0 }
 0x2cd   : > { %2133 = vmatmul.msk.f32.gmra.mxu0 %vm644_vm1, %v2315_v61 }
 0x2ce   : > { %2316 = vtanh.f32 %v1107_v62  ;;  %v3163_v62 = vld [vmem:[%s3604_s10] ss:$0 sm:$0xff] }
 0x2d3   : > { %v1109_v4 = vpop.f32.mrf.mxu2 }
 0x2d4   : > { %v2317_v23 = vpop.eup %2316  ;;  %v1110_v35 = vadd.f32 %v3081_v50, %v1109_v4 }
 0x2d5   : > { %2134 = vmatmul.msk.f32.gmra.mxu0 %vm644_vm1, %v2317_v23 }
 0x2d6   : > { %2318 = vtanh.f32 %v1110_v35 }
 0x2db   : > { %v1112_v7 = vpop.f32.mrf.mxu2 }
 0x2dc   : > { %v2319_v8 = vpop.eup %2318  ;;  %v1113_v46 = vadd.f32 %v3081_v50, %v1112_v7 }
 0x2dd   : > { %2135 = vmatmul.msk.f32.gmra.mxu0 %vm644_vm1, %v2319_v8  ;;  %v1724_v8 = vsel %vm502_vm0, %v3024_v32, 0.0 }
 0x2de   : > { %2320 = vtanh.f32 %v1113_v46 }
 0x2e0   : > { %1561 = vrot.lane.b32.xlu2 %v2973_v0, %s2487_s20 }
 0x2e3   : > { %v1115_v55 = vpop.f32.mrf.mxu2 }
 0x2e4   : > { %v2321_v59 = vpop.eup %2320  ;;  %v1116_v11 = vadd.f32 %v3081_v50, %v1115_v55 }
 0x2e5   : > { %2136 = vmatmul.msk.f32.gmra.mxu0 %vm644_vm1, %v2321_v59 }
 0x2e6   : > { %2322 = vtanh.f32 %v1116_v11 }
 0x2ea   : > { %1728 = vadd.xlane.f32.xlu0 %v1727_v14 }
 0x2eb   : > { %v1118_v63 = vpop.f32.mrf.mxu3 }
 0x2ec   : > { %v2323_v24 = vpop.eup %2322  ;;  %v1119_v0 = vadd.f32 %v3081_v50, %v1118_v63 }
 0x2ed   : > { %2137 = vmatmul.msk.f32.gmra.mxu0 %vm644_vm1, %v2323_v24  ;;  %1722 = vadd.xlane.f32.xlu1 %v1721_v9  ;;  %v1745_v24 = vsel %vm502_vm0, %v3071_v45, 0.0 }
 0x2ee   : > { %2324 = vtanh.f32 %v1119_v0 }
 0x2f3   : > { %v1121_v29 = vpop.f32.mrf.mxu3 }
 0x2f4   : > { %v2325_v15 = vpop.eup %2324  ;;  %v1122_v31 = vadd.f32 %v3081_v50, %v1121_v29  ;;  %v1679_v29 = vpop.permute.xlu1 %1678 }
 0x2f5   : > { %2138 = vmatmul.msk.f32.gmra.mxu0 %vm644_vm1, %v2325_v15  ;;  %v1739_v34 = vsel %vm502_vm0, %v1679_v29, 0.0 }
 0x2f6   : > { %2326 = vtanh.f32 %v1122_v31 }
 0x2fb   : > { %v1124_v16 = vpop.f32.mrf.mxu3 }
 0x2fc   : > { %v2327_v36 = vpop.eup %2326  ;;  %v1125_v39 = vadd.f32 %v3081_v50, %v1124_v16 }
 0x2fd   : > { %2139 = vmatmul.msk.f32.gmra.mxu0 %vm644_vm1, %v2327_v36 }
 0x2fe   : > { %2328 = vtanh.f32 %v1125_v39  ;;  %1575 = vrot.lane.b32.xlu0 %v3027_v33, %s2487_s20  ;;  %v1304_v33 = vld [vmem:[%s3605_s11 + $0x10] sm:$0xff] }
 0x2ff   : > { %1375 = vmatpush.msrb.mxu3 %v1304_v33 }
 0x301   : > { %1376 = vmatpush.msrb.mxu3 %v1303_v26 }
 0x303   : > { %v1127_v18 = vpop.f32.mrf.mxu3  ;;  %1377 = vmatpush.msrb.mxu3 %v1302_v57 }
 0x304   : > { %v2329_v6 = vpop.eup %2328  ;;  %v1128_v42 = vadd.f32 %v3081_v50, %v1127_v18 }
 0x305   : > { %2140 = vmatmul.msk.f32.gmra.mxu0 %vm644_vm1, %v2329_v6 }
 0x306   : > { %2330 = vtanh.f32 %v1128_v42  ;;  %1571 = vrot.lane.b32.xlu1 %v3008_v27, %s2487_s20 }
 0x309   : > { %1716 = vadd.xlane.f32.xlu2 %v1715_v12 }
 0x30b   : > { %v1130_v48 = vpop.f32.mrf.mxu3 }
 0x30c   : > { %v2331_v41 = vpop.eup %2330  ;;  %v1131_v49 = vadd.f32 %v3081_v50, %v1130_v48 }
 0x30d   : > { %2141 = vmatmul.msk.f32.gmra.mxu0 %vm644_vm1, %v2331_v41 }
 0x30e   : > { %2332 = vtanh.f32 %v1131_v49 }
 0x314   : > { %v2333_v27 = vpop.eup %2332  ;;  %v1133_v52 = vpop.f32.mrf.mxu3 }
 0x315   : > { %v1134_v53 = vadd.f32 %v3081_v50, %v1133_v52  ;;  %2142 = vmatmul.msk.f32.gmra.mxu0 %vm644_vm1, %v2333_v27 }
 0x317   : > { %2334 = vtanh.f32 %v1134_v53 }
 0x31c   : > { %v1136_v19 = vpop.f32.mrf.mxu3 }
 0x31d   : > { %v2335_v2 = vpop.eup %2334  ;;  %v1137_v56 = vadd.f32 %v3081_v50, %v1136_v19 }
 0x31e   : > { %2143 = vmatmul.msk.f32.gmra.mxu0 %vm644_vm1, %v2335_v2 }
 0x31f   : > { %2336 = vtanh.f32 %v1137_v56 }
 0x321   : > { %1567 = vrot.lane.b32.xlu2 %v2988_v5, %s2487_s20 }
 0x324   : > { %v1139_v38 = vpop.f32.mrf.mxu3 }
 0x325   : > { %v2337_v58 = vpop.eup %2336  ;;  %v1140_v54 = vadd.f32 %v3081_v50, %v1139_v38 }
 0x326   : > { %2144 = vmatmul.msk.f32.gmra.mxu0 %vm644_vm1, %v2337_v58 }
 0x327   : > { %2338 = vtanh.f32 %v1140_v54  ;;  %v3217_v54 = vld [vmem:[%s3606_s12] ss:$0 sm:$0xff] }
 0x328   : > { %1737 = vadd.xlane.f32.xlu0 %v1736_v3 }
 0x32d   : > { %v2339_v60 = vpop.eup %2338 }
 0x32e   : > { %2145 = vmatmul.msk.f32.gmra.mxu0 %vm644_vm1, %v2339_v60 }
 0x330   : > { %1731 = vadd.xlane.f32.xlu1 %v1730_v22  ;;  %v1742_v22 = vsel %vm502_vm0, %v3052_v20, 0.0 }
 0x334   : > { %v1142_v61 = vpop.f32.mrf.mxu3 }
 0x335   : > { %v1143_v5 = vadd.f32 %v3081_v50, %v1142_v61 }
 0x337   : > { %2340 = vtanh.f32 %v1143_v5 }
 0x33a   : > { %v1238_v4 = vpop.f32.mrf.mxu0 }
 0x33b   : > { %v1239_v17 = vadd.f32 %v3163_v62, %v1238_v4 }
 0x33c   : > { %1581 = vrot.lane.b32.xlu0 %v3055_v47, %s2487_s20 }
 0x33d   : > { %v2341_v23 = vpop.eup %2340  ;;  %2342 = vtanh.f32 %v1239_v17 }
 0x33e   : > { %2146 = vmatmul.msk.f32.gmra.mxu0 %vm644_vm1, %v2341_v23 }
 0x342   : > { %v1241_v35 = vpop.f32.mrf.mxu0 }
 0x343   : > { %v2343_v7 = vpop.eup %2342  ;;  %v1242_v50 = vadd.f32 %v3163_v62, %v1241_v35 }
 0x344   : > { %2147 = vmatmul.msk.f32.vlgmr.msrb.gmra.mxu3 %vm644_vm1, %v2343_v7 }
 0x345   : > { %2344 = vtanh.f32 %v1242_v50  ;;  %v3244_v50 = vpop.xlane.xlu2 %1704 }
 0x349   : > { %1577 = vrot.lane.b32.xlu1 %v3037_v37, %s2487_s20 }
 0x34a   : > { %v1244_v46 = vpop.f32.mrf.mxu0  ;;  %1725 = vadd.xlane.f32.xlu2 %v1724_v8 }
 0x34b   : > { %v2345_v47 = vpop.eup %2344  ;;  %v1245_v51 = vadd.f32 %v3163_v62, %v1244_v46 }
 0x34c   : > { %2148 = vmatmul.msk.f32.gmra.mxu3 %vm644_vm1, %v2345_v47 }
 0x34d   : > { %2346 = vtanh.f32 %v1245_v51 }
 0x352   : > { %v1247_v55 = vpop.f32.mrf.mxu0 }
 0x353   : > { %v2347_v59 = vpop.eup %2346  ;;  %v1248_v11 = vadd.f32 %v3163_v62, %v1247_v55 }
 0x354   : > { %2149 = vmatmul.msk.f32.gmra.mxu3 %vm644_vm1, %v2347_v59  ;;  %v3256_v59 = vpop.xlane.xlu1 %1701 }
 0x355   : > { %2348 = vtanh.f32 %v1248_v11 }
 0x35a   : > { %v1250_v13 = vpop.f32.mrf.mxu0 }
 0x35b   : > { %v2349_v32 = vpop.eup %2348  ;;  %v1251_v14 = vadd.f32 %v3163_v62, %v1250_v13 }
 0x35c   : > { %2150 = vmatmul.msk.f32.gmra.mxu3 %vm644_vm1, %v2349_v32 }
 0x35d   : > { %2350 = vtanh.f32 %v1251_v14 }
 0x362   : > { %v1253_v37 = vpop.f32.mrf.mxu0  ;;  %1573 = vrot.lane.b32.xlu2 %v3016_v30, %s2487_s20 }
 0x363   : > { %v2351_v10 = vpop.eup %2350  ;;  %v1254_v63 = vadd.f32 %v3163_v62, %v1253_v37  ;;  %v3266_v37 = vpop.permute.xlu1 %1559 }
 0x364   : > { %2151 = vmatmul.msk.f32.gmra.mxu3 %vm644_vm1, %v2351_v10 }
 0x365   : > { %2352 = vtanh.f32 %v1254_v63 }
 0x366   : > { %1746 = vadd.xlane.f32.xlu0 %v1745_v24 }
 0x36a   : > { %v1256_v0 = vpop.f32.mrf.mxu0 }
 0x36b   : > { %v2353_v9 = vpop.eup %2352  ;;  %v1257_v28 = vadd.f32 %v3163_v62, %v1256_v0 }
 0x36c   : > { %2152 = vmatmul.msk.f32.gmra.mxu3 %vm644_vm1, %v2353_v9 }
 0x36d   : > { %2354 = vtanh.f32 %v1257_v28  ;;  %v3275_v28 = vpop.xlane.xlu0 %1707 }
 0x372   : > { %v1259_v15 = vpop.f32.mrf.mxu0 }
 0x373   : > { %v2355_v30 = vpop.eup %2354  ;;  %v1260_v31 = vadd.f32 %v3163_v62, %v1259_v15  ;;  %1740 = vadd.xlane.f32.xlu1 %v1739_v34  ;;  %v3281_v15 = vpop.xlane.xlu1 %1713 }
 0x374   : > { %2153 = vmatmul.msk.f32.gmra.mxu3 %vm644_vm1, %v2355_v30 }
 0x375   : > { %2356 = vtanh.f32 %v1260_v31 }
 0x37a   : > { %v1262_v45 = vpop.f32.mrf.mxu0 }
 0x37b   : > { %v2357_v16 = vpop.eup %2356  ;;  %v1263_v36 = vadd.f32 %v3163_v62, %v1262_v45 }
 0x37c   : > { %2154 = vmatmul.msk.f32.gmra.mxu3 %vm644_vm1, %v2357_v16  ;;  %v3290_v16 = vpop.permute.xlu0 %1557 }
 0x37d   : > { %2358 = vtanh.f32 %v1263_v36 }
 0x382   : > { %v1265_v39 = vpop.f32.mrf.mxu0 }
 0x383   : > { %v2359_v18 = vpop.eup %2358  ;;  %v1266_v6 = vadd.f32 %v3163_v62, %v1265_v39  ;;  %v3295_v39 = vpop.permute.xlu1 %1565 }
 0x384   : > { %2155 = vmatmul.msk.f32.gmra.mxu3 %vm644_vm1, %v2359_v18 }
 0x385   : > { %2360 = vtanh.f32 %v1266_v6 }
 0x38a   : > { %v1268_v42 = vpop.f32.mrf.mxu0 }
 0x38b   : > { %v2361_v12 = vpop.eup %2360  ;;  %v1269_v33 = vadd.f32 %v3163_v62, %v1268_v42  ;;  %1734 = vadd.xlane.f32.xlu2 %v1733_v44 }
 0x38c   : > { %2156 = vmatmul.msk.f32.gmra.mxu3 %vm644_vm1, %v2361_v12  ;;  %1583 = vrot.lane.b32.xlu1 %v3065_v1, %s2487_s20 }
 0x38d   : > { %2362 = vtanh.f32 %v1269_v33  ;;  %v3305_v33 = vpop.permute.xlu0 %1563 }
 0x392   : > { %v1271_v48 = vpop.f32.mrf.mxu0 }
 0x393   : > { %v2363_v41 = vpop.eup %2362  ;;  %v1272_v49 = vadd.f32 %v3163_v62, %v1271_v48  ;;  %v3307_v48 = vpop.xlane.xlu1 %1722 }
 0x394   : > { %2157 = vmatmul.msk.f32.gmra.mxu3 %vm644_vm1, %v2363_v41 }
 0x395   : > { %2364 = vtanh.f32 %v1272_v49 }
 0x39b   : > { %v2365_v27 = vpop.eup %2364  ;;  %v1274_v52 = vpop.f32.mrf.mxu0 }
 0x39c   : > { %v1275_v40 = vadd.f32 %v3163_v62, %v1274_v52  ;;  %2158 = vmatmul.msk.f32.gmra.mxu3 %vm644_vm1, %v2365_v27 }
 0x39e   : > { %2366 = vtanh.f32 %v1275_v40 }
 0x3a3   : > { %v1277_v53 = vpop.f32.mrf.mxu0  ;;  %1579 = vrot.lane.b32.xlu2 %v3045_v43, %s2487_s20 }
 0x3a4   : > { %v2367_v26 = vpop.eup %2366  ;;  %v1278_v1 = vadd.f32 %v3163_v62, %v1277_v53 }
 0x3a5   : > { %2159 = vmatmul.msk.f32.gmra.mxu3 %vm644_vm1, %v2367_v26  ;;  %v3320_v26 = vpop.xlane.xlu0 %1719 }
 0x3a6   : > { %2368 = vtanh.f32 %v1278_v1  ;;  %v3322_v1 = vpop.permute.xlu1 %1571 }
 0x3ab   : > { %v1280_v19 = vpop.f32.mrf.mxu0 }
 0x3ac   : > { %v2369_v2 = vpop.eup %2368  ;;  %v1281_v56 = vadd.f32 %v3163_v62, %v1280_v19 }
 0x3ad   : > { %2160 = vmatmul.msk.f32.gmra.mxu3 %vm644_vm1, %v2369_v2 }
 0x3ae   : > { %2370 = vtanh.f32 %v1281_v56 }
 0x3b4   : > { %v2371_v57 = vpop.eup %2370 }
 0x3b5   : > { %2161 = vmatmul.msk.f32.gmra.mxu3 %vm644_vm1, %v2371_v57 }
 0x3bb   : > { %v1283_v38 = vpop.f32.mrf.mxu0 }
 0x3bc   : > { %v1284_v58 = vadd.f32 %v3163_v62, %v1283_v38  ;;  %v3333_v38 = vpop.permute.xlu0 %1569 }
 0x3be   : > { %2372 = vtanh.f32 %v1284_v58  ;;  %v3335_v58 = vpop.xlane.xlu1 %1731 }
 0x3c4   : > { %v2373_v43 = vpop.eup %2372 }
 0x3c5   : > { %2162 = vmatmul.msk.f32.gmra.mxu3 %vm644_vm1, %v2373_v43  ;;  %vm1953_vm1 = vcmask 1048512  }
 0x3c7   : > { %v1379_v3 = vpop.f32.mrf.mxu3 }
 0x3c8   : > { %v3221_v60 = vadd.f32 %v3217_v54, %v1379_v3 }
 0x3ca   : > { %v1427_v25 = vmul.f32 1.442695, %v3221_v60  ;;  %1764 = vrot.lane.b32.xlu1 %v3221_v60, %s2486_s0 }
 0x3cc   : > { %2374 = vpow2.f32 %v1427_v25  ;;  %1743 = vadd.xlane.f32.xlu2 %v1742_v22 }
 0x3cf   : > { %v1382_v61 = vpop.f32.mrf.mxu3 }
 0x3d0   : > { %v3247_v8 = vadd.f32 %v3217_v54, %v1382_v61  ;;  %v3344_v61 = vpop.xlane.xlu0 %1728 }
 0x3d2   : > { %v2375_v5 = vpop.eup %2374  ;;  %v1429_v51 = vmul.f32 1.442695, %v3247_v8 }
 0x3d3   : > { %1475 = vrot.lane.b32.xlu1 %v2375_v5, %s2486_s0  ;;  %v3346_v5 = vpop.permute.xlu1 %1577 }
 0x3d7   : > { %v1385_v62 = vpop.f32.mrf.mxu3 }
 0x3d8   : > { %v3230_v4 = vadd.f32 %v3217_v54, %v1385_v62 }
 0x3da   : > { %v1431_v17 = vmul.f32 1.442695, %v3230_v4  ;;  %1768 = vrot.lane.b32.xlu0 %v3230_v4, %s2486_s0 }
 0x3dc   : > { %2376 = vpow2.f32 %v1431_v17 }
 0x3df   : > { %v1388_v23 = vpop.f32.mrf.mxu3 }
 0x3e0   : > { %v3236_v35 = vadd.f32 %v3217_v54, %v1388_v23 }
 0x3e2   : > { %v2377_v20 = vpop.eup %2376  ;;  %v1433_v7 = vmul.f32 1.442695, %v3236_v35  ;;  %1770 = vrot.lane.b32.xlu1 %v3236_v35, %s2486_s0 }
 0x3e3   : > { %1479 = vrot.lane.b32.xlu0 %v2377_v20, %s2486_s0 }
 0x3e4   : > { %2378 = vpow2.f32 %v1433_v7  ;;  %1585 = vrot.lane.b32.xlu2 %v3076_v21, %s2487_s20  ;;  %v3260_v21 = vpop.permute.xlu2 %1555  ;;  %s3620_s20 = sshll.u32 %s3626_s27, 3  ;;  %s467_s27 = sand.u32 1, %s2476_s30  }
 0x3e5   : > { %2380 = vpow2.f32 %v1429_v51  ;;  %v3358_v51 = vpop.permute.xlu0 %1575  ;;  %s3397_s25 = scalar_lea.vmem %s3607_s13, %s3620_s20  ;;  %s468_s18 = scalar_lea.vmem [#allocation2], %s467_s27 }
 0x3e6   : > { %s1977_s1 = sshll.u32 %s468_s18, 4  ;;  %s1979_s20 = sshll.u32 %s1975_s26, 4  ;;  %s1978_s1 = int_to_ptr.vmem [resolvable:$true] %s1977_s1  ;;  %s1980_s20 = int_to_ptr.hbm [resolvable:$true] %s1979_s20 }
 0x3e7   : > { %v1391_v46 = vpop.f32.mrf.mxu3  ;;  %s1963_s17 = scalar_lea.sflag [#allocation3], %s467_s27  ;;  %s2436_s2 = sshra.s32 %s1980_s20, 4  ;;  %s2437_s2 = int_to_ptr.hbm [resolvable:$true] %s2436_s2 }
 0x3e8   : > { %v3250_v47 = vadd.f32 %v3217_v54, %v1391_v46  ;;  %s2438_s28 = scalar_lea.hbm %s2437_s2, 1  ;;  %p2443_p0 = scmp.lt.s32.totalorder %s2437_s2, %s3608_s14 }
 0x3e9   : > { %p2439_p11 = scmp.ne.s32.totalorder %s2437_s2, %s2438_s28 }
 0x3ea   : > { %v2379_v55 = vpop.eup %2378  ;;  %v1435_v0 = vmul.f32 1.442695, %v3250_v47 }
 0x3eb   : > { %1772 = vrot.lane.b32.xlu0 %v3250_v47, %s2486_s0  ;;  %1481 = vrot.lane.b32.xlu1 %v2379_v55, %s2486_s0  ;;  %v2381_v14 = vpop.eup %2380  ;;  %v3360_v55 = vpop.xlane.xlu1 %1740  ;;  %p2440_p12 = pnand %p2439_p11, %p2601_p5 }
 0x3ec   : > { %1766 = vrot.lane.b32.xlu2 %v3247_v8, %s2486_s0  ;;  %v3269_v10 = vpop.xlane.xlu2 %1710 }
 0x3ed   : > { %p2441_p13 = pneg %p2440_p12 }
 0x3ef   : > { %v1394_v11 = vpop.f32.mrf.mxu3 }
 0x3f0   : > { %v3263_v13 = vadd.f32 %v3217_v54, %v1394_v11 }
 0x3f2   : > { %v1437_v32 = vmul.f32 1.442695, %v3263_v13 }
 0x3f4   : > { %2382 = vpow2.f32 %v1437_v32  ;;  %1477 = vrot.lane.b32.xlu2 %v2381_v14, %s2486_s0  ;;  %v3288_v34 = vpop.permute.xlu2 %1561 }
 0x3f7   : > { %v1397_v63 = vpop.f32.mrf.mxu3 }
 0x3f8   : > { %v3272_v24 = vadd.f32 %v3217_v54, %v1397_v63 }
 0x3fa   : > { %v2383_v9 = vpop.eup %2382  ;;  %v1439_v29 = vmul.f32 1.442695, %v3272_v24  ;;  %1776 = vrot.lane.b32.xlu1 %v3272_v24, %s2486_s0 }
 0x3fb   : > { %1485 = vrot.lane.b32.xlu0 %v2383_v9, %s2486_s0 }
 0x3fc   : > { %2384 = vpow2.f32 %v1439_v29  ;;  %1774 = vrot.lane.b32.xlu2 %v3263_v13, %s2486_s0  ;;  %v3301_v42 = vpop.xlane.xlu2 %1716 }
 0x3fd   : > { %2386 = vpow2.f32 %v1435_v0  ;;  %v3369_v0 = vpop.xlane.xlu0 %1737 }
 0x3fe   : > { %v3371_v9 = vpop.permute.xlu1 %1583 }
 0x3ff   : > { %v1400_v30 = vpop.f32.mrf.mxu3 }
 0x400   : > { %v3286_v31 = vadd.f32 %v3217_v54, %v1400_v30 }
 0x402   : > { %v2385_v45 = vpop.eup %2384  ;;  %v1441_v44 = vmul.f32 1.442695, %v3286_v31 }
 0x403   : > { %v2387_v36 = vpop.eup %2386  ;;  %1778 = vrot.lane.b32.xlu0 %v3286_v31, %s2486_s0  ;;  %1487 = vrot.lane.b32.xlu1 %v2385_v45, %s2486_s0 }
 0x404   : > { %1483 = vrot.lane.b32.xlu2 %v2387_v36, %s2486_s0  ;;  %v3317_v53 = vpop.permute.xlu2 %1567 }
 0x407   : > { %v1403_v18 = vpop.f32.mrf.mxu3 }
 0x408   : > { %v3299_v6 = vadd.f32 %v3217_v54, %v1403_v18  ;;  %v3382_v18 = vpop.permute.xlu0 %1581 }
 0x40a   : > { %v1443_v12 = vmul.f32 1.442695, %v3299_v6 }
 0x40c   : > { %2388 = vpow2.f32 %v1443_v12  ;;  %1780 = vrot.lane.b32.xlu2 %v3299_v6, %s2486_s0  ;;  %v3328_v57 = vpop.xlane.xlu2 %1725 }
 0x40d   : > { %2390 = vpow2.f32 %v1441_v44 }
 0x40f   : > { %v1406_v41 = vpop.f32.mrf.mxu3 }
 0x410   : > { %v3312_v49 = vadd.f32 %v3217_v54, %v1406_v41 }
 0x412   : > { %v2389_v27 = vpop.eup %2388  ;;  %v1445_v52 = vmul.f32 1.442695, %v3312_v49  ;;  %1782 = vrot.lane.b32.xlu1 %v3312_v49, %s2486_s0 }
 0x413   : > { %v2391_v40 = vpop.eup %2390  ;;  %1491 = vrot.lane.b32.xlu0 %v2389_v27, %s2486_s0  ;;  %v3387_v27 = vpop.xlane.xlu0 %1746 }
 0x414   : > { %2392 = vpow2.f32 %v1445_v52  ;;  %1489 = vrot.lane.b32.xlu2 %v2391_v40, %s2486_s0  ;;  %v3348_v62 = vpop.permute.xlu2 %1573  ;;  %v2406_v40 = vld [vmem:[%s2623_s21] sm:$0xff] }
 0x417   : > { %v1409_v19 = vpop.f32.mrf.mxu3 }
 0x418   : > { %v3326_v2 = vadd.f32 %v3217_v54, %v1409_v19 }
 0x41a   : > { %v2393_v56 = vpop.eup %2392  ;;  %v1447_v43 = vmul.f32 1.442695, %v3326_v2 }
 0x41b   : > { %1784 = vrot.lane.b32.xlu0 %v3326_v2, %s2486_s0  ;;  %1493 = vrot.lane.b32.xlu1 %v2393_v56, %s2486_s0 }
 0x41c   : > { %2394 = vpow2.f32 %v1447_v43  ;;  %v3362_v11 = vpop.xlane.xlu2 %1734 }
 0x41f   : > { %v1412_v3 = vpop.f32.mrf.mxu3 }
 0x420   : > { %v3339_v25 = vadd.f32 %v3217_v54, %v1412_v3 }
 0x422   : > { %v1449_v22 = vmul.f32 1.442695, %v3339_v25  ;;  %1786 = vrot.lane.b32.xlu2 %v3339_v25, %s2486_s0  ;;  %v2395_v23 = vpop.eup %2394 }
 0x424   : > { %2396 = vpow2.f32 %v1449_v22  ;;  %v3374_v29 = vpop.permute.xlu2 %1579 }
 0x428   : > { %v1415_v17 = vpop.f32.mrf.mxu3 }
 0x429   : > { %v3351_v20 = vadd.f32 %v3217_v54, %v1415_v17 }
 0x42a   : > { %v2397_v7 = vpop.eup %2396  ;;  %1495 = vrot.lane.b32.xlu2 %v2395_v23, %s2486_s0 }
 0x42b   : > { %v1451_v46 = vmul.f32 1.442695, %v3351_v20  ;;  %1788 = vrot.lane.b32.xlu1 %v3351_v20, %s2486_s0  ;;  %1497 = vrot.lane.b32.xlu0 %v2397_v7, %s2486_s0 }
 0x42d   : > { %2398 = vpow2.f32 %v1451_v46 }
 0x430   : > { %v1418_v32 = vpop.f32.mrf.mxu3 }
 0x431   : > { %v3365_v14 = vadd.f32 %v3217_v54, %v1418_v32  ;;  %v2407_v32 = vld [vmem:[%s2623_s21 + $0x10] sm:$0xff] }
 0x433   : > { %v2399_v63 = vpop.eup %2398  ;;  %1790 = vrot.lane.b32.xlu0 %v3365_v14, %s2486_s0  ;;  %v1453_v30 = vmul.f32 1.442695, %v3365_v14 }
 0x434   : > { %1499 = vrot.lane.b32.xlu1 %v2399_v63, %s2486_s0 }
 0x435   : > { %2400 = vpow2.f32 %v1453_v30 }
 0x438   : > { %v1421_v45 = vpop.f32.mrf.mxu3 }
 0x439   : > { %v3378_v36 = vadd.f32 %v3217_v54, %v1421_v45 }
 0x43b   : > { %1792 = vrot.lane.b32.xlu2 %v3378_v36, %s2486_s0  ;;  %v2401_v41 = vpop.eup %2400 }
 0x43c   : > { %v1765_v44 = vpop.permute.xlu1 %1764 }
 0x43f   : > { %v3384_v12 = vpop.xlane.xlu2 %1743 }
 0x443   : > { %1501 = vrot.lane.b32.xlu2 %v2401_v41, %s2486_s0  ;;  %v2408_v41 = vld [vmem:[%s2623_s21 + $0x8] sm:$0xff] }
 0x445   : > { %v1476_v52 = vpop.permute.xlu1 %1475 }
 0x446   : > { %v1523_v19 = vmul.f32 %v2406_v40, %v1476_v52 }
 0x447   : > { %v3390_v56 = vpop.permute.xlu2 %1585 }
 0x448   : > { %v1539_v43 = vadd.f32 %v1523_v19, %v3221_v60  ;;  %v1424_v3 = vpop.f32.mrf.mxu3 }
 0x449   : > { %v3401_v22 = vadd.f32 %v3217_v54, %v1424_v3  ;;  %v1812_v3 = vsel %vm502_vm0, %v1765_v44, 0.0 }
 0x44a   : > { %v1603_v17 = vsel %vm502_vm0, %v1539_v43, %v3260_v21 }
 0x44b   : > { %1620 = vst.msk [vmem:[%s3397_s25] sm:$0xff] %vm1619_vm2, %v1603_v17  ;;  %v1457_v23 = vmul.f32 1.442695, %v3401_v22  ;;  %1794 = vrot.lane.b32.xlu1 %v3401_v22, %s2486_s0  ;;  %v2409_v17 = vld [vmem:[%s2623_s21 + $0x18] sm:$0xff] }
 0x44c   : > { %v3410_v7 = vpop.permute.xlu0 %1768 }
 0x44d   : > { %2402 = vpow2.f32 %v1457_v23 }
 0x44f   : > { %v1767_v60 = vpop.permute.xlu2 %1766 }
 0x453   : > { %v2403_v46 = vpop.eup %2402 }
 0x454   : > { %1505 = vrot.lane.b32.xlu1 %v2403_v46, %s2486_s0  ;;  %v3413_v54 = vpop.permute.xlu1 %1770 }
 0x455   : > { %v1480_v21 = vpop.permute.xlu0 %1479 }
 0x456   : > { %v1525_v63 = vmul.f32 %v2407_v32, %v1480_v21  ;;  %v2410_v32 = vld [vmem:[%s2623_s21 + $0x20] sm:$0xff] }
 0x457   : > { %v1478_v30 = vpop.permute.xlu2 %1477 }
 0x458   : > { %v1541_v45 = vadd.f32 %v1525_v63, %v3230_v4  ;;  %v1524_v52 = vmul.f32 %v2408_v41, %v1478_v30 }
 0x45a   : > { %v1605_v40 = vsel %vm502_vm0, %v1541_v45, %v3266_v37  ;;  %v1540_v19 = vadd.f32 %v1524_v52, %v3247_v8  ;;  %v1815_v45 = vsel %vm502_vm0, %v1767_v60, 0.0  ;;  %v2411_v52 = vld [vmem:[%s2623_s21 + $0x28] sm:$0xff] }
 0x45b   : > { %1622 = vst.msk [vmem:[%s3397_s25 + $0x10] sm:$0xff] %vm1619_vm2, %v1605_v40 }
 0x45c   : > { %v1604_v43 = vsel %vm502_vm0, %v1540_v19, %v3290_v16  ;;  %v1455_v16 = vmul.f32 1.442695, %v3378_v36 }
 0x45d   : > { %1621 = vst.msk [vmem:[%s3397_s25 + $0x8] sm:$0xff] %vm1619_vm2, %v1604_v43  ;;  %1813 = vadd.xlane.f32.xlu0 %v1812_v3  ;;  %v1482_v4 = vpop.permute.xlu1 %1481  ;;  %v1773_v21 = vpop.permute.xlu0 %1772 }
 0x45e   : > { %v1526_v23 = vmul.f32 %v2409_v17, %v1482_v4  ;;  %2404 = vpow2.f32 %v1455_v16  ;;  %v2412_v4 = vld [vmem:[%s2623_s21 + $0x30] sm:$0xff] }
 0x45f   : > { %v1775_v46 = vpop.permute.xlu2 %1774 }
 0x460   : > { %v1542_v37 = vadd.f32 %v1526_v23, %v3236_v35 }
 0x462   : > { %v1606_v8 = vsel %vm502_vm0, %v1542_v37, %v3288_v34 }
 0x463   : > { %1623 = vst.msk [vmem:[%s3397_s25 + $0x18] sm:$0xff] %vm1619_vm2, %v1606_v8 }
 0x464   : > { %v2405_v43 = vpop.eup %2404 }
 0x467   : > { %v1484_v44 = vpop.permute.xlu2 %1483 }
 0x468   : > { %v1527_v63 = vmul.f32 %v2410_v32, %v1484_v44 }
 0x46a   : > { %v1543_v30 = vadd.f32 %v1527_v63, %v3250_v47 }
 0x46c   : > { %v1607_v35 = vsel %vm502_vm0, %v1543_v30, %v3305_v33  ;;  %1816 = vadd.xlane.f32.xlu2 %v1815_v45  ;;  %v3440_v34 = vpop.permute.xlu1 %1776  ;;  %v1824_v33 = vsel %vm502_vm0, %v1773_v21, 0.0  ;;  %v2414_v45 = vld [vmem:[%s2623_s21 + $0x40] sm:$0xff] }
 0x46d   : > { %1624 = vst.msk [vmem:[%s3397_s25 + $0x20] sm:$0xff] %vm1619_vm2, %v1607_v35  ;;  %v1486_v41 = vpop.permute.xlu0 %1485 }
 0x46e   : > { %v1528_v40 = vmul.f32 %v2411_v52, %v1486_v41  ;;  %v2415_v52 = vld [vmem:[%s2623_s21 + $0x50] sm:$0xff] }
 0x46f   : > { %v1781_v19 = vpop.permute.xlu2 %1780 }
 0x470   : > { %v1544_v3 = vadd.f32 %v1528_v40, %v3263_v13  ;;  %v2413_v13 = vld [vmem:[%s2623_s21 + $0x38] sm:$0xff] }
 0x471   : > { %1503 = vrot.lane.b32.xlu0 %v2405_v43, %s2486_s0  ;;  %s2442_s0 = scalar_lea.hbm %s3608_s14, 2 }
 0x472   : > { %v1608_v47 = vsel %vm502_vm0, %v1544_v3, %v3295_v39  ;;  %p2444_p1 = scmp.lt.s32.totalorder %s2442_s0, %s2438_s28 }
 0x473   : > { %1625 = vst.msk [vmem:[%s3397_s25 + $0x28] sm:$0xff] %vm1619_vm2, %v1608_v47  ;;  %v1836_v47 = vsel %vm502_vm0, %v1781_v19, 0.0  ;;  %v1821_v19 = vsel %vm502_vm0, %v3413_v54, 0.0 }
 0x474   : > { %1825 = vadd.xlane.f32.xlu2 %v1824_v33  ;;  %p2445_p2 = por %p2444_p1, %p2443_p0 }
 0x475   : > { %v1488_v60 = vpop.permute.xlu1 %1487  ;;  %v1779_v8 = vpop.permute.xlu0 %1778 }
 0x476   : > { %v1529_v17 = vmul.f32 %v2412_v4, %v1488_v60  ;;  %v1833_v21 = vsel %vm502_vm0, %v1779_v8, 0.0  ;;  %p2446_p3 = pnand %p2445_p2, %p2441_p13 }
 0x477   : > { %v1490_v23 = vpop.permute.xlu2 %1489 }
 0x478   : > { %v1545_v37 = vadd.f32 %v1529_v17, %v3272_v24  ;;  %v1530_v16 = vmul.f32 %v2413_v13, %v1490_v23  ;;  %v1818_v24 = vsel %vm502_vm0, %v3410_v7, 0.0 }
 0x47a   : > { %v1609_v44 = vsel %vm502_vm0, %v1545_v37, %v3317_v53  ;;  %v1546_v39 = vadd.f32 %v1530_v16, %v3286_v31  ;;  %v1827_v31 = vsel %vm502_vm0, %v1775_v46, 0.0  ;;  %v2418_v16 = vld [vmem:[%s2623_s21 + $0x58] sm:$0xff] }
 0x47b   : > { %1626 = vst.msk [vmem:[%s3397_s25 + $0x30] sm:$0xff] %vm1619_vm2, %v1609_v44 }
 0x47c   : > { %v1610_v32 = vsel %vm502_vm0, %v1546_v39, %v3333_v38  ;;  %1834 = vadd.xlane.f32.xlu2 %v1833_v21 }
 0x47d   : > { %1627 = vst.msk [vmem:[%s3397_s25 + $0x38] sm:$0xff] %vm1619_vm2, %v1610_v32  ;;  %v1830_v32 = vsel %vm502_vm0, %v3440_v34, 0.0 }
 0x47e   : > { %1819 = vadd.xlane.f32.xlu1 %v1818_v24 }
 0x47f   : > { %v1787_v53 = vpop.permute.xlu2 %1786 }
 0x480   : > { %v1845_v17 = vsel %vm502_vm0, %v1787_v53, 0.0 }
 0x484   : > { %v1783_v63 = vpop.permute.xlu1 %1782 }
 0x485   : > { %v1492_v30 = vpop.permute.xlu0 %1491  ;;  %v1839_v34 = vsel %vm502_vm0, %v1783_v63, 0.0 }
 0x486   : > { %1828 = vadd.xlane.f32.xlu1 %v1827_v31  ;;  %v1531_v35 = vmul.f32 %v2414_v45, %v1492_v30 }
 0x487   : > { %v1496_v41 = vpop.permute.xlu2 %1495 }
 0x488   : > { %v1547_v38 = vadd.f32 %v1531_v35, %v3299_v6  ;;  %v1533_v40 = vmul.f32 %v2415_v52, %v1496_v41  ;;  %v2416_v6 = vld [vmem:[%s2623_s21 + $0x48] sm:$0xff]  ;;  %v2420_v52 = vld [vmem:[%s2623_s21 + $0x78] sm:$0xff] }
 0x48a   : > { %v1611_v7 = vsel %vm502_vm0, %v1547_v38, %v3322_v1  ;;  %v1549_v43 = vadd.f32 %v1533_v40, %v3326_v2 }
 0x48b   : > { %1628 = vst.msk [vmem:[%s3397_s25 + $0x40] sm:$0xff] %vm1619_vm2, %v1611_v7 }
 0x48c   : > { %v1613_v46 = vsel %vm502_vm0, %v1549_v43, %v3358_v51  ;;  %v2421_v43 = vld [vmem:[%s2623_s21 + $0x70] sm:$0xff] }
 0x48d   : > { %1630 = vst.msk [vmem:[%s3397_s25 + $0x50] sm:$0xff] %vm1619_vm2, %v1613_v46  ;;  %v1494_v3 = vpop.permute.xlu1 %1493  ;;  %v1785_v33 = vpop.permute.xlu0 %1784 }
 0x48e   : > { %v1532_v60 = vmul.f32 %v2416_v6, %v1494_v3  ;;  %1837 = vadd.xlane.f32.xlu1 %v1836_v47  ;;  %v1842_v4 = vsel %vm502_vm0, %v1785_v33, 0.0 }
 0x48f   : > { %1843 = vadd.xlane.f32.xlu2 %v1842_v4 }
 0x490   : > { %v1548_v1 = vadd.f32 %v1532_v60, %v3312_v49  ;;  %v2417_v49 = vld [vmem:[%s2623_s21 + $0x68] sm:$0xff]  ;;  %v1892_v60 = vlaneseq }
 0x492   : > { %v1612_v2 = vsel %vm502_vm0, %v1548_v1, %v3348_v62  ;;  %v3528_v4 = vand.u32 127, %v1892_v60 }
 0x493   : > { %1629 = vst.msk [vmem:[%s3397_s25 + $0x48] sm:$0xff] %vm1619_vm2, %v1612_v2 }
 0x494   : > { %v1895_v2 = vadd.s32 4294967288, %v3528_v4 }
 0x495   : > { %v1793_v51 = vpop.permute.xlu2 %1792 }
 0x496   : > { %1846 = vadd.xlane.f32.xlu1 %v1845_v17  ;;  %v1854_v8 = vsel %vm502_vm0, %v1793_v51, 0.0  ;;  %v1899_v17 = vadd.s32 4294967280, %v3528_v4 }
 0x49b   : > { %1822 = vadd.xlane.f32.xlu0 %v1821_v19  ;;  %v1903_v19 = vadd.s32 4294967272, %v3528_v4 }
 0x49d   : > { %v1502_v23 = vpop.permute.xlu2 %1501  ;;  %v1789_v37 = vpop.permute.xlu1 %1788 }
 0x49e   : > { %v1536_v13 = vmul.f32 %v2417_v49, %v1502_v23  ;;  %1855 = vadd.xlane.f32.xlu1 %v1854_v8  ;;  %v1498_v62 = vpop.permute.xlu0 %1497 }
 0x49f   : > { %v1534_v44 = vmul.f32 %v2418_v16, %v1498_v62 }
 0x4a0   : > { %v1552_v39 = vadd.f32 %v1536_v13, %v3365_v14  ;;  %v2419_v14 = vld [vmem:[%s2623_s21 + $0x60] sm:$0xff] }
 0x4a1   : > { %v1550_v21 = vadd.f32 %v1534_v44, %v3339_v25 }
 0x4a2   : > { %v1616_v54 = vsel %vm502_vm0, %v1552_v39, %v3382_v18 }
 0x4a3   : > { %1633 = vst.msk [vmem:[%s3397_s25 + $0x68] sm:$0xff] %vm1619_vm2, %v1616_v54  ;;  %v1614_v24 = vsel %vm502_vm0, %v1550_v21, %v3346_v5  ;;  %1831 = vadd.xlane.f32.xlu0 %v1830_v32  ;;  %v1848_v5 = vsel %vm502_vm0, %v1789_v37, 0.0  ;;  %v1915_v21 = vadd.s32 4294967248, %v3528_v4  ;;  %v1911_v54 = vadd.s32 4294967256, %v3528_v4 }
 0x4a4   : > { %1631 = vst.msk [vmem:[%s3397_s25 + $0x58] sm:$0xff] %vm1619_vm2, %v1614_v24 }
 0x4a6   : > { %v1500_v53 = vpop.permute.xlu1 %1499  ;;  %v1791_v31 = vpop.permute.xlu0 %1790 }
 0x4a7   : > { %v1535_v25 = vmul.f32 %v2419_v14, %v1500_v53  ;;  %v1851_v30 = vsel %vm502_vm0, %v1791_v31, 0.0 }
 0x4a8   : > { %1852 = vadd.xlane.f32.xlu2 %v1851_v30 }
 0x4a9   : > { %v1551_v18 = vadd.f32 %v1535_v25, %v3351_v20  ;;  %v1919_v25 = vadd.s32 4294967240, %v3528_v4 }
 0x4ab   : > { %v1615_v45 = vsel %vm502_vm0, %v1551_v18, %v3374_v29  ;;  %1840 = vadd.xlane.f32.xlu0 %v1839_v34 }
 0x4ac   : > { %1632 = vst.msk [vmem:[%s3397_s25 + $0x60] sm:$0xff] %vm1619_vm2, %v1615_v45 }
 0x4b3   : > { %1849 = vadd.xlane.f32.xlu0 %v1848_v5 }
 0x4bd   : > { %v1795_v35 = vpop.permute.xlu1 %1794 }
 0x4be   : > { %v1857_v41 = vsel %vm502_vm0, %v1795_v35, 0.0 }
 0x4bf   : > { %1858 = vadd.xlane.f32.xlu0 %v1857_v41 }
 0x4c6   : > { %v1506_v38 = vpop.permute.xlu1 %1505 }
 0x4c7   : > { %v1538_v20 = vmul.f32 %v2420_v52, %v1506_v38 }
 0x4c9   : > { %v1554_v63 = vadd.f32 %v1538_v20, %v3401_v22 }
 0x4cb   : > { %v1618_v29 = vsel %vm502_vm0, %v1554_v63, %v3390_v56 }
 0x4cc   : > { %1635 = vst.msk [vmem:[%s3397_s25 + $0x78] sm:$0xff] %vm1619_vm2, %v1618_v29  ;;  %v1931_v29 = vadd.s32 4294967216, %v3528_v4 }
 0x4d0   : > { %v1814_v40 = vpop.xlane.xlu0 %1813 }
 0x4df   : > { %v1817_v6 = vpop.xlane.xlu2 %1816 }
 0x4e0   : > { %v1861_v51 = vadd.f32 %v1817_v6, %v3244_v50  ;;  %v1907_v50 = vadd.s32 4294967264, %v3528_v4 }
 0x4e2   : > { %v1896_v37 = vperm.slane %v1861_v51, %v1895_v2  ;;  %v1947_v51 = vadd.s32 4294967184, %v3528_v4 }
 0x4e3   : > { %v1504_v7 = vpop.permute.xlu0 %1503 }
 0x4e4   : > { %v1537_v46 = vmul.f32 %v2421_v43, %v1504_v7  ;;  %v1939_v43 = vadd.s32 4294967200, %v3528_v4 }
 0x4e6   : > { %v1553_v3 = vadd.f32 %v1537_v46, %v3378_v36  ;;  %v1935_v46 = vadd.s32 4294967208, %v3528_v4 }
 0x4e7   : > { %v1826_v1 = vpop.xlane.xlu2 %1825 }
 0x4e8   : > { %v1617_v47 = vsel %vm502_vm0, %v1553_v3, %v3371_v9  ;;  %v1860_v9 = vadd.f32 %v1814_v40, %v3256_v59  ;;  %v1864_v16 = vadd.f32 %v1826_v1, %v3281_v15  ;;  %v1943_v1 = vadd.s32 4294967192, %v3528_v4 }
 0x4e9   : > { %1634 = vst.msk [vmem:[%s3397_s25 + $0x70] sm:$0xff] %vm1619_vm2, %v1617_v47  ;;  %vm1949_vm0 = vcmask 982912  }
 0x4ea   : > { %v1894_v13 = vperm.slane %v1860_v9, %v3528_v4  ;;  %v1908_v53 = vperm.slane %v1864_v16, %v1907_v50  ;;  %v1951_v9 = vadd.s32 4294967176, %v3528_v4 }
 0x4ef   : > { %v1835_v59 = vpop.xlane.xlu2 %1834 }
 0x4f0   : > { %v1867_v30 = vadd.f32 %v1835_v59, %v3307_v48 }
 0x4f1   : > { %v1820_v33 = vpop.xlane.xlu1 %1819 }
 0x4f2   : > { %v1862_v36 = vadd.f32 %v1820_v33, %v3275_v28  ;;  %v1898_v28 = vsel %vm1897_vm3, %v1896_v37, %v1894_v13  ;;  %v1920_v38 = vperm.slane %v1867_v30, %v1919_v25 }
 0x4f4   : > { %v1900_v8 = vperm.slane %v1862_v36, %v1899_v17 }
 0x4f6   : > { %v1902_v39 = vsel %vm1901_vm4, %v1900_v8, %v1898_v28 }
 0x4f9   : > { %v1829_v56 = vpop.xlane.xlu1 %1828 }
 0x4fa   : > { %v1865_v32 = vadd.f32 %v1829_v56, %v3301_v42  ;;  %v1923_v42 = vadd.s32 4294967232, %v3528_v4 }
 0x4fc   : > { %v1912_v18 = vperm.slane %v1865_v32, %v1911_v54 }
 0x501   : > { %v1838_v44 = vpop.xlane.xlu1 %1837 }
 0x502   : > { %v1868_v5 = vadd.f32 %v1838_v44, %v3328_v57  ;;  %v1844_v35 = vpop.xlane.xlu2 %1843 }
 0x503   : > { %v1870_v40 = vadd.f32 %v1844_v35, %v3335_v58 }
 0x504   : > { %v1924_v48 = vperm.slane %v1868_v5, %v1923_v42 }
 0x505   : > { %v1932_v33 = vperm.slane %v1870_v40, %v1931_v29 }
 0x509   : > { %v1847_v52 = vpop.xlane.xlu1 %1846 }
 0x50a   : > { %v1871_v3 = vadd.f32 %v1847_v52, %v3362_v11 }
 0x50e   : > { %v1823_v22 = vpop.xlane.xlu0 %1822 }
 0x50f   : > { %v1863_v23 = vadd.f32 %v1823_v22, %v3269_v10  ;;  %v1936_v22 = vperm.slane %v1871_v3, %v1935_v46 }
 0x511   : > { %v1904_v62 = vperm.slane %v1863_v23, %v1903_v19  ;;  %v1856_v56 = vpop.xlane.xlu1 %1855 }
 0x512   : > { %v1874_v11 = vadd.f32 %v1856_v56, %v3384_v12 }
 0x513   : > { %v1906_v24 = vsel %vm1905_vm5, %v1904_v62, %v1902_v39 }
 0x514   : > { %v1910_v31 = vsel %vm1909_vm6, %v1908_v53, %v1906_v24  ;;  %v1948_v37 = vperm.slane %v1874_v11, %v1947_v51 }
 0x515   : > { %v1914_v34 = vsel %vm1913_vm7, %v1912_v18, %v1910_v31 }
 0x516   : > { %v1832_v49 = vpop.xlane.xlu0 %1831 }
 0x517   : > { %v1866_v10 = vadd.f32 %v1832_v49, %v3320_v26  ;;  %v1927_v26 = vadd.s32 4294967224, %v3528_v4 }
 0x519   : > { %v1916_v14 = vperm.slane %v1866_v10, %v1915_v21 }
 0x51b   : > { %v1918_v41 = vsel %vm1917_vm8, %v1916_v14, %v1914_v34  ;;  %v1853_v6 = vpop.xlane.xlu2 %1852 }
 0x51c   : > { %v1922_v20 = vsel %vm1921_vm9, %v1920_v38, %v1918_v41  ;;  %v1873_v2 = vadd.f32 %v1853_v6, %v3360_v55 }
 0x51e   : > { %v1841_v15 = vpop.xlane.xlu0 %1840  ;;  %v1944_v36 = vperm.slane %v1873_v2, %v1943_v1 }
 0x51f   : > { %v1869_v45 = vadd.f32 %v1841_v15, %v3344_v61  ;;  %v1926_v61 = vsel %vm1925_vm10, %v1924_v48, %v1922_v20 }
 0x521   : > { %v1928_v63 = vperm.slane %v1869_v45, %v1927_v26 }
 0x523   : > { %v1930_v47 = vsel %vm1929_vm11, %v1928_v63, %v1926_v61 }
 0x524   : > { %v1934_v60 = vsel %vm1933_vm12, %v1932_v33, %v1930_v47 }
 0x526   : > { %v1850_v7 = vpop.xlane.xlu0 %1849 }
 0x527   : > { %v1872_v57 = vadd.f32 %v1850_v7, %v3369_v0  ;;  %v1938_v0 = vsel %vm1937_vm13, %v1936_v22, %v1934_v60 }
 0x529   : > { %v1940_v58 = vperm.slane %v1872_v57, %v1939_v43 }
 0x52b   : > { %v1942_v17 = vsel %vm1941_vm14, %v1940_v58, %v1938_v0 }
 0x52c   : > { %v1946_v55 = vsel %vm1945_vm15, %v1944_v36, %v1942_v17 }
 0x52d   : > { %v1950_v8 = vsel %vm1949_vm0, %v1948_v37, %v1946_v55 }
 0x532   : > { %v1859_v19 = vpop.xlane.xlu0 %1858 }
 0x533   : > { %v1875_v23 = vadd.f32 %v1859_v19, %v3387_v27 }
 0x535   : > { %v1952_v12 = vperm.slane %v1875_v23, %v1951_v9 }
 0x537   : > { %v1954_v49 = vsel %vm1953_vm1, %v1952_v12, %v1950_v8 }
 0x538   : > { %1956 = vst [vmem:[%s468_s18] sm:$0x1] %v1954_v49 }
 0x539   : > { %2449 = shalt.err (!%p2446_p3)
}
 0x53a   : > { %2167 = dma.vmem_to_hbm [thread:$0]  (%p2601_p5), %s1978_s1, 16, %s1980_s20, %s1963_s17  }
 0x53b PF: > { %p2173_p4 = scmp.ge.s32.totalorder %s2484_s16, 2  ;;  %s1999_s27 = sand.u32 1, %s2472_s29  }
 0x53c   : > { %s2000_s18 = scalar_lea.sflag [#allocation3], %s1999_s27 }
 0x53d   : > { %p2170_p7 = pnand %p2173_p4, %p2605_p6 }
 0x53f   : > { %p2171_p8 = pneg %p2170_p7 }
 0x541   : > { %2467 = dma.done.wait (%p2171_p8), %s2000_s18, 16  }
 0x542   : > { %2469 = vsyncadd (%p2171_p8), %s2000_s18, 4294967280  ;;  %p25_p9 = scmp.ge.s32.totalorder %s2588_s19, 4   ;;  %s3621_s29 = smov %s2476_s30 }
 0x543   : > { %s3622_s30 = smov %s2480_s15  ;;  %s3623_s15 = smov %s2599_s22 }
 0x544   : > { %s3624_s16 = smov %s2588_s19  ;;  %27 = sbr.rel (!%p25_p9) target bundleno = 8 (0x8), region = 119 }
 0x549   :  { %2005 = vsyncpa [#allocation3], 1 }
 0x54a   :  { %2007 = vsyncpa [#allocation3 + $0x1], 1 }

</bundles_post_ra>
